<compile_context>
chip_gen: v6e
topology: v6e:2x2x1
jax: 0.10.0
libtpu: 0.0.40
codegen_flags: <defaults>
</compile_context>

<pallas_src>
import functools

import jax
import jax.numpy as jnp
import numpy as np
from jax.experimental import pallas as pl
from jax.experimental.pallas import tpu as pltpu


def _msa_col_global_attn_kernel(
        x_ref,                      # [S, Rb, D]    block of residue columns (original layout)
        mask_rs_ref,                # [Rb, S]       mask, residues-major (f32)
        mask_sr_ref,                # [S, Rb, 1]    mask, sequences-major (f32)
        gamma_ref, beta_ref,        # [1, D]        f32
        qw_ref,                     # [D, H*kd]     matmul dtype
        kvgw_ref,                   # [D, H*vd+kd+vd]  fused [gate|k|v] weight, matmul dtype
        gb_ref,                     # [1, H*vd]     f32
        ow_ref,                     # [H*vd, out]   matmul dtype
        ob_ref,                     # [1, out]      f32
        o_ref,                      # [S, Rb, out]
        *, num_head, key_dim, value_dim, mm_dtype):
    S, R, D = x_ref.shape
    HV = num_head * value_dim

    x = x_ref[...].astype(jnp.float32)

    # ---- LayerNorm over msa_dim (eps=1e-5, biased variance, like nn.LayerNorm) -- f32
    mu = jnp.mean(x, axis=-1, keepdims=True)
    xc = x - mu
    var = jnp.mean(xc * xc, axis=-1, keepdims=True)
    xn = xc * jax.lax.rsqrt(var + 1e-5)
    xn = xn * gamma_ref[...][None] + beta_ref[...][None]            # [S, R, D] f32

    mask_rs = mask_rs_ref[...]                                      # [R, S]   f32
    mask_sr = mask_sr_ref[...]                                      # [S, R, 1] f32 (no transpose)

    # ---- masked mean over the sequence axis -> one query vector per residue column
    msum = jnp.sum(mask_sr * xn, axis=0)                            # [R, D]
    denom = jnp.sum(mask_rs, axis=1, keepdims=True) + 1e-10         # [R, 1]
    q_avg = msum / denom                                            # [R, D] f32

    # ---- single fused projection over the whole (seq x residue) slab: [gate | k | v]
    xf = xn.reshape(S * R, D).astype(mm_dtype)
    fused = jnp.dot(xf, kvgw_ref[...],
                    preferred_element_type=jnp.float32)             # [S*R, HV+kd+vd] f32
    gate_logits = fused[:, :HV]                                     # [S*R, HV] f32
    kproj = fused[:, HV:HV + key_dim].astype(mm_dtype)              # [S*R, kd]
    vproj = fused[:, HV + key_dim:].astype(mm_dtype)                # [S*R, vd]

    # ---- all heads at once
    scale = key_dim ** -0.5
    q_all = jnp.dot(q_avg.astype(mm_dtype), qw_ref[...],
                    preferred_element_type=jnp.float32) * scale     # [R, H*kd] f32
    q_heads = q_all.reshape(R, num_head, key_dim).astype(mm_dtype)  # [R, H, kd]

    # TODO(synk): fold this batch transpose into dot_general dimension_numbers
    # (non-leading batch dims) once safe in the Mosaic lowering; it is done on
    # narrow (mm_dtype) data to halve the relayout bytes.
    k_t = jnp.swapaxes(kproj.reshape(S, R, key_dim), 0, 1)          # [R, S, kd]
    v_t = jnp.swapaxes(vproj.reshape(S, R, value_dim), 0, 1)        # [R, S, vd]

    bias = (1e9 * (mask_rs - 1.0))[:, None, :]                      # [R, 1, S] f32
    logits = jnp.einsum('rhc,rsc->rhs', q_heads, k_t,
                        preferred_element_type=jnp.float32) + bias  # [R, H, S] f32
    m = jnp.max(logits, axis=-1, keepdims=True)
    e = jnp.exp(logits - m)
    w = e * (1.0 / jnp.sum(e, axis=-1, keepdims=True))              # exact inverse, one divide
    wa = jnp.einsum('rhs,rsc->rhc', w.astype(mm_dtype), v_t,
                    preferred_element_type=jnp.float32)             # [R, H, vd] f32
    wa_flat = wa.reshape(R, HV)                                     # [R, H*vd]

    # ---- sigmoid gating, computed right before use (keeps the slab's live range short)
    gate = jax.nn.sigmoid(gate_logits + gb_ref[...])                # [S*R, HV] f32
    gated = (gate.reshape(S, R, HV) * wa_flat[None, :, :]).reshape(S * R, HV)

    # ---- output projection, single whole-slab store
    out = jnp.dot(gated.astype(mm_dtype), ow_ref[...],
                  preferred_element_type=jnp.float32) + ob_ref[...]
    o_ref[...] = out.reshape(S, R, -1).astype(o_ref.dtype)


def _pick_vmem_limit_bytes():
    """Generation-aware scoped-VMEM limit (~48 MiB on v7x, ~96-100 MiB on v5e/v6e)."""
    cap = None
    try:
        info = pltpu.get_tpu_info()
        for name in ("vmem_capacity_bytes", "vmem_bytes", "vmem_size_bytes"):
            v = getattr(info, name, None)
            if v:
                cap = int(v)
                break
    except Exception:
        cap = None
    if cap is None:
        cap = 64 * 1024 * 1024        # conservative fallback = v7x physical VMEM
    return min(int(0.75 * cap), 100 * 1024 * 1024)


def _choose_r_block(n_seq, n_res, msa_dim, *, vmem_limit_bytes, io_bytes, mm_bytes):
    """Residue-block size from a per-column live-set estimate that includes N_seq."""
    col_f32 = float(n_seq * msa_dim * 4)     # one f32 "slab" per residue column
    # f32-slab equivalents per column:
    #   2x dbl-buffered input + 2x dbl-buffered output blocks (io dtype)
    #   xn + fused(~1.5) + gate + f32 out temp   (~4.5)
    #   xf / gated / k_t+v_t / q operands        (~3.0 in matmul dtype)
    #   logits / softmax / mask / misc           (~1.0)
    factor = 4.0 * (io_bytes / 4.0) + 4.5 + 3.0 * (mm_bytes / 4.0) + 1.0
    per_col = col_f32 * factor
    rb = int((0.6 * vmem_limit_bytes) // max(per_col, 1.0))
    rb = max(8, min(rb, 512))
    rb -= rb % 8
    if rb >= n_res:
        if n_res >= 16:
            # keep >=2 grid steps so the residue axis can shard across v7x's two
            # TensorCores (measured-neutral on single-core v5e/v6e)
            half = -(-n_res // 2)
            rb = max(8, ((half + 7) // 8) * 8)
        else:
            rb = n_res
    # TODO(synk): when even rb=8 exceeds the budget (very deep extra-MSA), add a
    # sequence-axis tiling path (online softmax + two-pass masked mean).
    return rb


def msa_column_global_attention(msa_act, msa_mask, params, *, num_head,
                                matmul_dtype=jnp.bfloat16, r_block=None):
    """msa_act: [N_seq, N_res, msa_dim]; msa_mask: [N_seq, N_res] -> [N_seq, N_res, msa_dim]."""
    n_seq, n_res, msa_dim = msa_act.shape
    assert msa_dim % num_head == 0
    key_dim = msa_dim // num_head
    value_dim = msa_dim // num_head
    out_dim = msa_dim
    io_dtype = msa_act.dtype
    mm_dtype = jnp.dtype(matmul_dtype)

    # Big activation is passed through in the caller's dtype (no wrapper-side f32 copy).
    # Only the tiny 2-D mask is duplicated in both layouts (KBs of extra DMA).
    mask_rs = jnp.swapaxes(msa_mask, 0, 1).astype(jnp.float32)      # [Rtot, S]
    mask_sr = msa_mask.astype(jnp.float32)[..., None]               # [S, Rtot, 1]

    gamma = params["gamma"].reshape(1, msa_dim).astype(jnp.float32)
    beta = params["beta"].reshape(1, msa_dim).astype(jnp.float32)
    qw = params["q_w"].reshape(msa_dim, num_head * key_dim).astype(mm_dtype)
    # Fused [gate | k | v] weight: gate block first so the big slice needs no lane shift.
    kvg_w = jnp.concatenate(
        [params["gating_w"].reshape(msa_dim, num_head * value_dim),
         params["k_w"].reshape(msa_dim, key_dim),
         params["v_w"].reshape(msa_dim, value_dim)], axis=1).astype(mm_dtype)
    gb = params["gating_b"].reshape(1, num_head * value_dim).astype(jnp.float32)
    ow = params["o_w"].reshape(num_head * value_dim, out_dim).astype(mm_dtype)
    ob = params["o_b"].reshape(1, out_dim).astype(jnp.float32)

    vmem_limit = _pick_vmem_limit_bytes()
    rb = r_block if r_block is not None else _choose_r_block(
        n_seq, n_res, msa_dim, vmem_limit_bytes=vmem_limit,
        io_bytes=jnp.dtype(io_dtype).itemsize, mm_bytes=mm_dtype.itemsize)
    grid = (pl.cdiv(n_res, rb),)

    def col_map(r):
        return (0, r, 0)

    def mask_rs_map(r):
        return (r, 0)

    def mask_sr_map(r):
        return (0, r, 0)

    def param_map(r):
        return (0, 0)

    kernel = functools.partial(_msa_col_global_attn_kernel,
                               num_head=num_head, key_dim=key_dim,
                               value_dim=value_dim, mm_dtype=mm_dtype)

    # Note: the constant-index weight/bias blocks are grid-invariant; Mosaic keeps them
    # resident across steps.  TODO(synk): pin them with pipeline_mode=pl.Buffered(1)
    # once single-buffered invariant inputs are portable across jax versions.
    out = pl.pallas_call(
        kernel,
        out_shape=jax.ShapeDtypeStruct((n_seq, n_res, out_dim), io_dtype),
        grid_spec=pltpu.PrefetchScalarGridSpec(
            num_scalar_prefetch=0,
            grid=grid,
            in_specs=[
                pl.BlockSpec((n_seq, rb, msa_dim), col_map),                           # x
                pl.BlockSpec((rb, n_seq), mask_rs_map),                                # mask [R,S]
                pl.BlockSpec((n_seq, rb, 1), mask_sr_map),                             # mask [S,R,1]
                pl.BlockSpec((1, msa_dim), param_map),                                 # gamma
                pl.BlockSpec((1, msa_dim), param_map),                                 # beta
                pl.BlockSpec((msa_dim, num_head * key_dim), param_map),                # q_w
                pl.BlockSpec((msa_dim, num_head * value_dim + key_dim + value_dim),
                             param_map),                                               # [gate|k|v]
                pl.BlockSpec((1, num_head * value_dim), param_map),                    # gating_b
                pl.BlockSpec((num_head * value_dim, out_dim), param_map),              # o_w
                pl.BlockSpec((1, out_dim), param_map),                                 # o_b
            ],
            out_specs=pl.BlockSpec((n_seq, rb, out_dim), col_map),
        ),
        compiler_params=pltpu.CompilerParams(
            dimension_semantics=("parallel",),
            vmem_limit_bytes=int(vmem_limit)),
    )(msa_act, mask_rs, mask_sr, gamma, beta, qw, kvg_w, gb, ow, ob)

    return out   # PyTorch convention [N_seq, N_res, out_dim]


def reference_forward(msa_act, msa_mask, params, *, num_head):
    """Pure-JAX f32 mirror of the PyTorch module for correctness checking."""
    msa_dim = msa_act.shape[-1]
    key_dim = msa_dim // num_head
    x = jnp.swapaxes(msa_act, 0, 1)
    mask = jnp.swapaxes(msa_mask, 0, 1)
    mu = jnp.mean(x, -1, keepdims=True)
    var = jnp.var(x, -1, keepdims=True)
    xn = (x - mu) / jnp.sqrt(var + 1e-5) * params["gamma"] + params["beta"]
    q_mask = mask[..., None]
    v = jnp.einsum("bka,ac->bkc", xn, params["v_w"])
    q_avg = jnp.sum(q_mask * xn, axis=1) / (jnp.sum(q_mask, axis=1) + 1e-10)
    q = jnp.einsum("ba,ahc->bhc", q_avg, params["q_w"]) * key_dim ** (-0.5)
    k = jnp.einsum("bka,ac->bkc", xn, params["k_w"])
    bias = 1e9 * (q_mask[:, None, :, 0] - 1.0)
    logits = jnp.einsum("bhc,bkc->bhk", q, k) + bias
    w = jax.nn.softmax(logits, axis=-1)
    wa = jnp.einsum("bhk,bkc->bhc", w, v)
    gate = jax.nn.sigmoid(
        jnp.einsum("bqc,chv->bqhv", xn, params["gating_w"]) + params["gating_b"])
    wa = wa[:, None] * gate
    out = jnp.einsum("bqhc,hco->bqo", wa, params["o_w"]) + params["o_b"]
    return jnp.swapaxes(out, 0, 1)


if __name__ == "__main__":
    # Small shapes: N_seq=8 sequences, N_res=16 residues, msa_dim=32, 4 heads.
    N_SEQ, N_RES, MSA_DIM, NUM_HEAD = 8, 16, 32, 4
    KEY_DIM = VALUE_DIM = MSA_DIM // NUM_HEAD

    key = jax.random.PRNGKey(0)
    keys = jax.random.split(key, 12)

    msa_act = jax.random.normal(keys[0], (N_SEQ, N_RES, MSA_DIM), jnp.float32)
    msa_mask = (jax.random.uniform(keys[1], (N_SEQ, N_RES)) > 0.2).astype(jnp.float32)

    # Deterministic synthetic parameters (zero_init would make the output identically
    # zero, so use small randoms with the module's parameter shapes).
    params = {
        "gamma":    1.0 + 0.1 * jax.random.normal(keys[2], (MSA_DIM,), jnp.float32),
        "beta":     0.1 * jax.random.normal(keys[3], (MSA_DIM,), jnp.float32),
        "q_w":      0.1 * jax.random.normal(keys[4], (MSA_DIM, NUM_HEAD, KEY_DIM), jnp.float32),
        "k_w":      0.1 * jax.random.normal(keys[5], (MSA_DIM, KEY_DIM), jnp.float32),
        "v_w":      0.1 * jax.random.normal(keys[6], (MSA_DIM, VALUE_DIM), jnp.float32),
        "gating_w": 0.1 * jax.random.normal(keys[7], (MSA_DIM, NUM_HEAD, VALUE_DIM), jnp.float32),
        "gating_b": 1.0 + 0.1 * jax.random.normal(keys[8], (NUM_HEAD, VALUE_DIM), jnp.float32),
        "o_w":      0.1 * jax.random.normal(keys[9], (NUM_HEAD, VALUE_DIM, MSA_DIM), jnp.float32),
        "o_b":      0.1 * jax.random.normal(keys[10], (MSA_DIM,), jnp.float32),
    }

    ref = reference_forward(msa_act, msa_mask, params, num_head=NUM_HEAD)

    # 1) strict check: f32 matmul operands must match the f32 reference to 1e-4
    out_f32 = jax.block_until_ready(
        msa_column_global_attention(msa_act, msa_mask, params,
                                    num_head=NUM_HEAD, matmul_dtype=jnp.float32))
    np.testing.assert_allclose(np.asarray(out_f32), np.asarray(ref), rtol=1e-4, atol=1e-4)

    # 2) default perf path: bf16 matmul operands with f32 accumulation (looser tolerance)
    out_bf16 = jax.block_until_ready(
        msa_column_global_attention(msa_act, msa_mask, params, num_head=NUM_HEAD))
    np.testing.assert_allclose(np.asarray(out_bf16), np.asarray(ref), rtol=3e-2, atol=3e-2)

    # 3) non-divisible residue count: tail grid block is padded; padded columns are
    #    independent and their writes are dropped, valid region must still match.
    N_RES2 = 20
    msa_act2 = jax.random.normal(keys[11], (N_SEQ, N_RES2, MSA_DIM), jnp.float32)
    msa_mask2 = (jax.random.uniform(keys[1], (N_SEQ, N_RES2)) > 0.2).astype(jnp.float32)
    out2 = jax.block_until_ready(
        msa_column_global_attention(msa_act2, msa_mask2, params,
                                    num_head=NUM_HEAD, matmul_dtype=jnp.float32))
    ref2 = reference_forward(msa_act2, msa_mask2, params, num_head=NUM_HEAD)
    np.testing.assert_allclose(np.asarray(out2), np.asarray(ref2), rtol=1e-4, atol=1e-4)

    print("KERNEL_OK")
</pallas_src>

<mosaic_0001>
module attributes {stable_mosaic.version = 11 : i64} {
  func.func @_msa_col_global_attn_kernel(%arg0: i32, %arg1: memref<8x8x32xf32, #tpu.memory_space<vmem>>, %arg2: memref<8x8xf32, #tpu.memory_space<vmem>>, %arg3: memref<8x8x1xf32, #tpu.memory_space<vmem>>, %arg4: memref<1x32xf32, #tpu.memory_space<vmem>>, %arg5: memref<1x32xf32, #tpu.memory_space<vmem>>, %arg6: memref<32x32xf32, #tpu.memory_space<vmem>>, %arg7: memref<32x48xf32, #tpu.memory_space<vmem>>, %arg8: memref<1x32xf32, #tpu.memory_space<vmem>>, %arg9: memref<32x32xf32, #tpu.memory_space<vmem>>, %arg10: memref<1x32xf32, #tpu.memory_space<vmem>>, %arg11: memref<8x8x32xf32, #tpu.memory_space<vmem>>) attributes {dimension_semantics = [#tpu.dimension_semantics<parallel>], iteration_bounds = array<i64: 2>, scalar_prefetch = 0 : i64, scratch_operands = 0 : i64, tpu.core_type = #tpu.core_type<tc>, window_params = [{transform_indices = @transform_0, window_bounds = array<i64: 8, 8, 32>}, {transform_indices = @transform_1, window_bounds = array<i64: 8, 8>}, {transform_indices = @transform_2, window_bounds = array<i64: 8, 8, 1>}, {pipeline_mode = #tpu.pipeline_mode<synchronous>, transform_indices = @transform_3, window_bounds = array<i64: 1, 32>}, {pipeline_mode = #tpu.pipeline_mode<synchronous>, transform_indices = @transform_4, window_bounds = array<i64: 1, 32>}, {pipeline_mode = #tpu.pipeline_mode<synchronous>, transform_indices = @transform_5, window_bounds = array<i64: 32, 32>}, {pipeline_mode = #tpu.pipeline_mode<synchronous>, transform_indices = @transform_6, window_bounds = array<i64: 32, 48>}, {pipeline_mode = #tpu.pipeline_mode<synchronous>, transform_indices = @transform_7, window_bounds = array<i64: 1, 32>}, {pipeline_mode = #tpu.pipeline_mode<synchronous>, transform_indices = @transform_8, window_bounds = array<i64: 32, 32>}, {pipeline_mode = #tpu.pipeline_mode<synchronous>, transform_indices = @transform_9, window_bounds = array<i64: 1, 32>}, {transform_indices = @transform_10, window_bounds = array<i64: 8, 8, 32>}]} {
    %c0 = arith.constant 0 : index
    %c0_0 = arith.constant 0 : index
    %c0_1 = arith.constant 0 : index
    %0 = vector.load %arg1[%c0, %c0_0, %c0_1] : memref<8x8x32xf32, #tpu.memory_space<vmem>>, vector<8x8x32xf32>
    %cst = arith.constant dense<0.000000e+00> : vector<8x8xf32>
    %1 = vector.multi_reduction <add>, %0, %cst [2] : vector<8x8x32xf32> to vector<8x8xf32>
    %2 = vector.shape_cast %1 : vector<8x8xf32> to vector<8x8x1xf32>
    %cst_2 = arith.constant 3.200000e+01 : f32
    %3 = vector.broadcast %cst_2 : f32 to vector<8x8x1xf32>
    %4 = arith.divf %2, %3 : vector<8x8x1xf32>
    %5 = vector.broadcast %4 : vector<8x8x1xf32> to vector<8x8x32xf32>
    %6 = arith.subf %0, %5 : vector<8x8x32xf32>
    %7 = arith.mulf %6, %6 : vector<8x8x32xf32>
    %cst_3 = arith.constant dense<0.000000e+00> : vector<8x8xf32>
    %8 = vector.multi_reduction <add>, %7, %cst_3 [2] : vector<8x8x32xf32> to vector<8x8xf32>
    %9 = vector.shape_cast %8 : vector<8x8xf32> to vector<8x8x1xf32>
    %cst_4 = arith.constant 3.200000e+01 : f32
    %10 = vector.broadcast %cst_4 : f32 to vector<8x8x1xf32>
    %11 = arith.divf %9, %10 : vector<8x8x1xf32>
    %cst_5 = arith.constant 9.99999974E-6 : f32
    %12 = vector.broadcast %cst_5 : f32 to vector<8x8x1xf32>
    %13 = arith.addf %11, %12 : vector<8x8x1xf32>
    %14 = math.rsqrt %13 : vector<8x8x1xf32>
    %15 = vector.broadcast %14 : vector<8x8x1xf32> to vector<8x8x32xf32>
    %16 = arith.mulf %6, %15 : vector<8x8x32xf32>
    %c0_6 = arith.constant 0 : index
    %c0_7 = arith.constant 0 : index
    %17 = vector.load %arg4[%c0_6, %c0_7] : memref<1x32xf32, #tpu.memory_space<vmem>>, vector<1x32xf32>
    %18 = vector.shape_cast %17 : vector<1x32xf32> to vector<1x1x32xf32>
    %19 = vector.broadcast %18 : vector<1x1x32xf32> to vector<8x8x32xf32>
    %20 = arith.mulf %16, %19 : vector<8x8x32xf32>
    %c0_8 = arith.constant 0 : index
    %c0_9 = arith.constant 0 : index
    %21 = vector.load %arg5[%c0_8, %c0_9] : memref<1x32xf32, #tpu.memory_space<vmem>>, vector<1x32xf32>
    %22 = vector.shape_cast %21 : vector<1x32xf32> to vector<1x1x32xf32>
    %23 = vector.broadcast %22 : vector<1x1x32xf32> to vector<8x8x32xf32>
    %24 = arith.addf %20, %23 : vector<8x8x32xf32>
    %c0_10 = arith.constant 0 : index
    %c0_11 = arith.constant 0 : index
    %25 = vector.load %arg2[%c0_10, %c0_11] : memref<8x8xf32, #tpu.memory_space<vmem>>, vector<8x8xf32>
    %c0_12 = arith.constant 0 : index
    %c0_13 = arith.constant 0 : index
    %c0_14 = arith.constant 0 : index
    %26 = vector.load %arg3[%c0_12, %c0_13, %c0_14] : memref<8x8x1xf32, #tpu.memory_space<vmem>>, vector<8x8x1xf32>
    %27 = vector.broadcast %26 : vector<8x8x1xf32> to vector<8x8x32xf32>
    %28 = arith.mulf %27, %24 : vector<8x8x32xf32>
    %cst_15 = arith.constant dense<0.000000e+00> : vector<8x32xf32>
    %29 = vector.multi_reduction <add>, %28, %cst_15 [0] : vector<8x8x32xf32> to vector<8x32xf32>
    %cst_16 = arith.constant dense<0.000000e+00> : vector<8xf32>
    %30 = vector.multi_reduction <add>, %25, %cst_16 [1] : vector<8x8xf32> to vector<8xf32>
    %31 = vector.shape_cast %30 : vector<8xf32> to vector<8x1xf32>
    %cst_17 = arith.constant 1.000000e-10 : f32
    %32 = vector.broadcast %cst_17 : f32 to vector<8x1xf32>
    %33 = arith.addf %31, %32 : vector<8x1xf32>
    %34 = vector.broadcast %33 : vector<8x1xf32> to vector<8x32xf32>
    %35 = arith.divf %29, %34 : vector<8x32xf32>
    %36 = vector.shape_cast %24 : vector<8x8x32xf32> to vector<64x32xf32>
    %c0_18 = arith.constant 0 : index
    %c0_19 = arith.constant 0 : index
    %37 = vector.load %arg7[%c0_18, %c0_19] : memref<32x48xf32, #tpu.memory_space<vmem>>, vector<32x48xf32>
    %cst_20 = arith.constant dense<0.000000e+00> : vector<64x48xf32>
    %38 = tpu.matmul %36, %37, %cst_20 {dimension_numbers = #tpu.dot_dimension_numbers<[1], [0], [0], [1], [0, 0, 1, 1], [], []>} : vector<64x32xf32>, vector<32x48xf32>, vector<64x48xf32> -> vector<64x48xf32>
    %39 = vector.extract_strided_slice %38 {offsets = [0, 0], sizes = [64, 32], strides = [1, 1]} : vector<64x48xf32> to vector<64x32xf32>
    %40 = vector.extract_strided_slice %38 {offsets = [0, 32], sizes = [64, 8], strides = [1, 1]} : vector<64x48xf32> to vector<64x8xf32>
    %41 = vector.extract_strided_slice %38 {offsets = [0, 40], sizes = [64, 8], strides = [1, 1]} : vector<64x48xf32> to vector<64x8xf32>
    %c0_21 = arith.constant 0 : index
    %c0_22 = arith.constant 0 : index
    %42 = vector.load %arg6[%c0_21, %c0_22] : memref<32x32xf32, #tpu.memory_space<vmem>>, vector<32x32xf32>
    %cst_23 = arith.constant dense<0.000000e+00> : vector<8x32xf32>
    %43 = tpu.matmul %35, %42, %cst_23 {dimension_numbers = #tpu.dot_dimension_numbers<[1], [0], [0], [1], [0, 0, 1, 1], [], []>} : vector<8x32xf32>, vector<32x32xf32>, vector<8x32xf32> -> vector<8x32xf32>
    %cst_24 = arith.constant 0.353553385 : f32
    %44 = vector.broadcast %cst_24 : f32 to vector<8x32xf32>
    %45 = arith.mulf %43, %44 : vector<8x32xf32>
    %46 = vector.shape_cast %45 : vector<8x32xf32> to vector<8x4x8xf32>
    %47 = vector.shape_cast %40 : vector<64x8xf32> to vector<8x8x8xf32>
    %48 = tpu.transpose %47, [1, 0, 2] : vector<8x8x8xf32> -> vector<8x8x8xf32>
    %49 = vector.shape_cast %41 : vector<64x8xf32> to vector<8x8x8xf32>
    %50 = tpu.transpose %49, [1, 0, 2] : vector<8x8x8xf32> -> vector<8x8x8xf32>
    %cst_25 = arith.constant 1.000000e+00 : f32
    %51 = vector.broadcast %cst_25 : f32 to vector<8x8xf32>
    %52 = arith.subf %25, %51 : vector<8x8xf32>
    %cst_26 = arith.constant 1.000000e+09 : f32
    %53 = vector.broadcast %cst_26 : f32 to vector<8x8xf32>
    %54 = arith.mulf %53, %52 : vector<8x8xf32>
    %55 = vector.shape_cast %54 : vector<8x8xf32> to vector<8x1x8xf32>
    "tpu.trace_start"() <{level = 10 : i32, message = "rhc,rsc->rhs"}> : () -> ()
    %cst_27 = arith.constant dense<0.000000e+00> : vector<8x4x8xf32>
    %56 = tpu.matmul %46, %48, %cst_27 {dimension_numbers = #tpu.dot_dimension_numbers<[2], [2], [1], [1], [0, 0, 0, 1, 1, 1], [0], [0]>} : vector<8x4x8xf32>, vector<8x8x8xf32>, vector<8x4x8xf32> -> vector<8x4x8xf32>
    "tpu.trace_stop"() : () -> ()
    %57 = vector.broadcast %55 : vector<8x1x8xf32> to vector<8x4x8xf32>
    %58 = arith.addf %56, %57 : vector<8x4x8xf32>
    %cst_28 = arith.constant dense<0xFF800000> : vector<8x4xf32>
    %59 = vector.multi_reduction <maximumf>, %58, %cst_28 [2] : vector<8x4x8xf32> to vector<8x4xf32>
    %60 = vector.shape_cast %59 : vector<8x4xf32> to vector<8x4x1xf32>
    %61 = vector.broadcast %60 : vector<8x4x1xf32> to vector<8x4x8xf32>
    %62 = arith.subf %58, %61 : vector<8x4x8xf32>
    %63 = math.exp %62 : vector<8x4x8xf32>
    %cst_29 = arith.constant dense<0.000000e+00> : vector<8x4xf32>
    %64 = vector.multi_reduction <add>, %63, %cst_29 [2] : vector<8x4x8xf32> to vector<8x4xf32>
    %65 = vector.shape_cast %64 : vector<8x4xf32> to vector<8x4x1xf32>
    %cst_30 = arith.constant 1.000000e+00 : f32
    %66 = vector.broadcast %cst_30 : f32 to vector<8x4x1xf32>
    %67 = arith.divf %66, %65 : vector<8x4x1xf32>
    %68 = vector.broadcast %67 : vector<8x4x1xf32> to vector<8x4x8xf32>
    %69 = arith.mulf %63, %68 : vector<8x4x8xf32>
    "tpu.trace_start"() <{level = 10 : i32, message = "rhs,rsc->rhc"}> : () -> ()
    %cst_31 = arith.constant dense<0.000000e+00> : vector<8x4x8xf32>
    %70 = tpu.matmul %69, %50, %cst_31 {dimension_numbers = #tpu.dot_dimension_numbers<[2], [1], [1], [2], [0, 0, 0, 1, 1, 2], [0], [0]>} : vector<8x4x8xf32>, vector<8x8x8xf32>, vector<8x4x8xf32> -> vector<8x4x8xf32>
    "tpu.trace_stop"() : () -> ()
    %71 = vector.shape_cast %70 : vector<8x4x8xf32> to vector<8x32xf32>
    %c0_32 = arith.constant 0 : index
    %c0_33 = arith.constant 0 : index
    %72 = vector.load %arg8[%c0_32, %c0_33] : memref<1x32xf32, #tpu.memory_space<vmem>>, vector<1x32xf32>
    %73 = vector.broadcast %72 : vector<1x32xf32> to vector<64x32xf32>
    %74 = arith.addf %39, %73 : vector<64x32xf32>
    %75 = arith.negf %74 : vector<64x32xf32>
    %76 = math.exp %75 : vector<64x32xf32>
    %cst_34 = arith.constant 1.000000e+00 : f32
    %77 = vector.broadcast %cst_34 : f32 to vector<64x32xf32>
    %78 = arith.addf %77, %76 : vector<64x32xf32>
    %79 = arith.divf %77, %78 : vector<64x32xf32>
    %80 = vector.shape_cast %79 : vector<64x32xf32> to vector<8x8x32xf32>
    %81 = vector.shape_cast %71 : vector<8x32xf32> to vector<1x8x32xf32>
    %82 = vector.broadcast %81 : vector<1x8x32xf32> to vector<8x8x32xf32>
    %83 = arith.mulf %80, %82 : vector<8x8x32xf32>
    %84 = vector.shape_cast %83 : vector<8x8x32xf32> to vector<64x32xf32>
    %c0_35 = arith.constant 0 : index
    %c0_36 = arith.constant 0 : index
    %85 = vector.load %arg9[%c0_35, %c0_36] : memref<32x32xf32, #tpu.memory_space<vmem>>, vector<32x32xf32>
    %cst_37 = arith.constant dense<0.000000e+00> : vector<64x32xf32>
    %86 = tpu.matmul %84, %85, %cst_37 {dimension_numbers = #tpu.dot_dimension_numbers<[1], [0], [0], [1], [0, 0, 1, 1], [], []>} : vector<64x32xf32>, vector<32x32xf32>, vector<64x32xf32> -> vector<64x32xf32>
    %c0_38 = arith.constant 0 : index
    %c0_39 = arith.constant 0 : index
    %87 = vector.load %arg10[%c0_38, %c0_39] : memref<1x32xf32, #tpu.memory_space<vmem>>, vector<1x32xf32>
    %88 = vector.broadcast %87 : vector<1x32xf32> to vector<64x32xf32>
    %89 = arith.addf %86, %88 : vector<64x32xf32>
    %90 = vector.shape_cast %89 : vector<64x32xf32> to vector<8x8x32xf32>
    %c0_40 = arith.constant 0 : index
    %c0_41 = arith.constant 0 : index
    %c0_42 = arith.constant 0 : index
    %91 = vector.load %arg11[%c0_40, %c0_41, %c0_42] : memref<8x8x32xf32, #tpu.memory_space<vmem>>, vector<8x8x32xf32>
    tpu.vector_store %arg11[%c0_40, %c0_41, %c0_42], %90 {strides = array<i32>} : memref<8x8x32xf32, #tpu.memory_space<vmem>>, vector<8x8x32xf32>,
    return
  }
  func.func @transform_0(%arg0: i32) -> (i32, i32, i32) {
    %c0_i32 = arith.constant 0 : i32
    %c0_i32_0 = arith.constant 0 : i32
    %c0_i32_1 = arith.constant 0 : i32
    return %c0_i32, %arg0, %c0_i32_0 : i32, i32, i32
  }
  func.func @transform_1(%arg0: i32) -> (i32, i32) {
    %c0_i32 = arith.constant 0 : i32
    %c0_i32_0 = arith.constant 0 : i32
    return %arg0, %c0_i32 : i32, i32
  }
  func.func @transform_2(%arg0: i32) -> (i32, i32, i32) {
    %c0_i32 = arith.constant 0 : i32
    %c0_i32_0 = arith.constant 0 : i32
    %c0_i32_1 = arith.constant 0 : i32
    return %c0_i32, %arg0, %c0_i32_0 : i32, i32, i32
  }
  func.func @transform_3(%arg0: i32) -> (i32, i32) {
    %c0_i32 = arith.constant 0 : i32
    %c0_i32_0 = arith.constant 0 : i32
    %c0_i32_1 = arith.constant 0 : i32
    return %c0_i32, %c0_i32_0 : i32, i32
  }
  func.func @transform_4(%arg0: i32) -> (i32, i32) {
    %c0_i32 = arith.constant 0 : i32
    %c0_i32_0 = arith.constant 0 : i32
    %c0_i32_1 = arith.constant 0 : i32
    return %c0_i32, %c0_i32_0 : i32, i32
  }
  func.func @transform_5(%arg0: i32) -> (i32, i32) {
    %c0_i32 = arith.constant 0 : i32
    %c0_i32_0 = arith.constant 0 : i32
    %c0_i32_1 = arith.constant 0 : i32
    return %c0_i32, %c0_i32_0 : i32, i32
  }
  func.func @transform_6(%arg0: i32) -> (i32, i32) {
    %c0_i32 = arith.constant 0 : i32
    %c0_i32_0 = arith.constant 0 : i32
    %c0_i32_1 = arith.constant 0 : i32
    return %c0_i32, %c0_i32_0 : i32, i32
  }
  func.func @transform_7(%arg0: i32) -> (i32, i32) {
    %c0_i32 = arith.constant 0 : i32
    %c0_i32_0 = arith.constant 0 : i32
    %c0_i32_1 = arith.constant 0 : i32
    return %c0_i32, %c0_i32_0 : i32, i32
  }
  func.func @transform_8(%arg0: i32) -> (i32, i32) {
    %c0_i32 = arith.constant 0 : i32
    %c0_i32_0 = arith.constant 0 : i32
    %c0_i32_1 = arith.constant 0 : i32
    return %c0_i32, %c0_i32_0 : i32, i32
  }
  func.func @transform_9(%arg0: i32) -> (i32, i32) {
    %c0_i32 = arith.constant 0 : i32
    %c0_i32_0 = arith.constant 0 : i32
    %c0_i32_1 = arith.constant 0 : i32
    return %c0_i32, %c0_i32_0 : i32, i32
  }
  func.func @transform_10(%arg0: i32) -> (i32, i32, i32) {
    %c0_i32 = arith.constant 0 : i32
    %c0_i32_0 = arith.constant 0 : i32
    %c0_i32_1 = arith.constant 0 : i32
    return %c0_i32, %arg0, %c0_i32_0 : i32, i32, i32
  }
}

</mosaic_0001>

<bundles_post_ra>
// kernel: tpu_custom_call.1
= control target key start
LH: loop header
LB: loop body
LE: loop exit
PB: predicated region body
PF: predicated region fallthrough
CT: control target
= control target key end

     0   :  { %s4447_s0 = inlined_call_operand.vmem [shape: f32[8,16,32], index: 0, kind: input, shape index: {}]   ;;  %s4448_s1 = inlined_call_operand.vmem [shape: f32[16,8], index: 1, kind: input, shape index: {}]   ;;  %s4449_s2 = inlined_call_operand.vmem [shape: f32[8,16,1], index: 2, kind: input, shape index: {}]   ;;  %s4450_s3 = inlined_call_operand.vmem [shape: f32[1,32], index: 3, kind: input, shape index: {}]   ;;  %s4451_s4 = inlined_call_operand.vmem [shape: f32[1,32], index: 4, kind: input, shape index: {}]   ;;  %s4452_s5 = inlined_call_operand.vmem [shape: f32[32,32], index: 5, kind: input, shape index: {}]   ;;  %s4453_s6 = inlined_call_operand.hbm [shape: f32[32,48], index: 6, kind: input, shape index: {}]   ;;  %s4454_s7 = inlined_call_operand.vmem [shape: f32[1,32], index: 7, kind: input, shape index: {}]   ;;  %s4455_s8 = inlined_call_operand.hbm [shape: f32[32,32], index: 8, kind: input, shape index: {}]   ;;  %s4456_s9 = inlined_call_operand.vmem [shape: f32[1,32], index: 9, kind: input, shape index: {}]   ;;  %s4457_s10 = inlined_call_operand.hbm [shape: f32[8,16,32], index: 10, kind: output, shape index: {}]  }
   0x1   :  { %4460 = sst [smem:[#allocation14_spill]] %s4453_s6 }
   0x2   :  { %15 = vsyncpa [#allocation5], 0 }
   0x3   :  { %16 = vsyncpa [#allocation8], 0 }
   0x4   :  { %17 = vsyncpa [#allocation6], 0 }
   0x5   :  { %19 = vsyncpa [#allocation6 + $0x1], 0  ;;  %s3835_s13 = smov 0   ;;  %s3837_s14 = smov 0  }
   0x6   :  { %s3839_s15 = smov 0   ;;  %s3841_s16 = smov 0  }
   0x7 LB: > { %s3856_s17 = sadd.s32 4294967295, %s3757_s16   ;;  %s3209_s18 = sadd.s32 4294967294, %s3757_s16   ;;  %s3757_s16 = sphi %s3841_s16, %s4478_s16   ;;  %s3753_s15 = sphi %s3839_s15, %s4477_s15   ;;  %s3749_s14 = sphi %s3837_s14, %s4476_s14   ;;  %s3745_s13 = sphi %s3835_s13, %s4475_s13  }
   0x8   : > { %s3860_s19 = sadd.s32 1, %s3757_s16   ;;  %s32_s20 = sadd.s32 1, %s3753_s15 }
   0x9   : > { %s29_s21 = ssub.s32 %s3757_s16, %s3860_s19  ;;  %p39_p0 = scmp.ne.s32.totalorder %s3753_s15, %s3749_s14 }
   0xa   : > { %p30_p1 = scmp.eq.s32.totalorder %s29_s21, 0  ;;  %p40_p2 = scmp.eq.s32.totalorder %s3757_s16, 0 }
   0xb   : > { %p268_p3 = scmp.eq.s32.totalorder %s3856_s17, 1  ;;  %p273_p4 = scmp.ne.s32.totalorder %s3749_s14, %s3745_s13 }
   0xc   : > { %s3872_s22 = scalar_select %p30_p1, %s3753_s15, %s32_s20  }
   0xd   : > { %p3874_p5 = por %p40_p2, %p39_p0  ;;  %p3878_p6 = por %p268_p3, %p39_p0 }
   0xe   : > { %4461 = sst [smem:[#allocation13_spill]] %s3872_s22  ;;  %p274_p7 = scmp.eq.s32.totalorder %s3209_s18, 1 }
   0xf   : > { %s4463_s24 = scalar_select %p3878_p6, 1, 0 }
  0x10   : > { %p3210_p8 = scmp.ge.s32.totalorder %s3757_s16, 1  ;;  %p281_p9 = scmp.lt.s32.totalorder %s3757_s16, 3 }
  0x11   : > { %p3884_p10 = por %p274_p7, %p273_p4  ;;  %p4458_p11 = scmp.eq.s32.totalorder %s3856_s17, 0 }
  0x12   : > { %p3889_p12 = pnand %p3210_p8, %p281_p9  ;;  %s3759_s27 = smov [#allocation4]  }
  0x13   : > { %s4464_s25 = scalar_select %p3884_p10, 1, 0 }
  0x14   : > { %s302_s28 = sshll.u32 %s3759_s27, 4  ;;  %p3485_p13 = pneg %p3889_p12  ;;  %s303_s28 = int_to_ptr.vmem [resolvable:$true] %s302_s28 }
  0x15   : > { %s3760_s30 = smov [#allocation7]   ;;  %s3648_s12 = scalar_lea.vmem %s303_s28, 512 }
  0x16   : > { %p3897_p0 = pnand %p4458_p11, %p3485_p13  ;;  %s318_s11 = sshll.u32 %s3760_s30, 4  ;;  %s319_s11 = int_to_ptr.vmem [resolvable:$true] %s318_s11 }
  0x17   : > { %p3649_p2 = scmp.ne.s32.totalorder %s303_s28, %s3648_s12  ;;  %p3656_p7 = scmp.lt.s32.totalorder %s303_s28, %s303_s28 }
  0x18   : > { %p3639_p1 = pneg %p3897_p0  ;;  %p3657_p8 = scmp.lt.s32.totalorder %s3648_s12, %s3648_s12 }
  0x1a   : > { %p3651_p3 = pnand %p3649_p2, %p3639_p1  ;;  %p3658_p9 = por %p3657_p8, %p3656_p7 }
  0x1c   : > { %p3652_p4 = pneg %p3651_p3 }
  0x1e   : > { %p3659_p13 = pnand %p3658_p9, %p3652_p4 }
  0x20   : > { %3662 = shalt.err (!%p3659_p13)
}
  0x21   : > { %s3761_s18 = smov 128   ;;  %s3762_s20 = smov 8  }
  0x22   : > { %s4467_s6 = sld [smem:[#allocation14_spill]]  ;;  %s3674_s30 = scalar_lea.vmem %s319_s11, 512 }
  0x23   : > { %p3675_p11 = scmp.ne.s32.totalorder %s319_s11, %s3674_s30  ;;  %p3682_p10 = scmp.lt.s32.totalorder %s319_s11, %s319_s11 }
  0x24   : > { %p3683_p6 = scmp.lt.s32.totalorder %s3674_s30, %s3674_s30 }
  0x25   : > { %p3677_p2 = pnand %p3675_p11, %p3639_p1 }
  0x26   : > { %p3684_p7 = por %p3683_p6, %p3682_p10 }
  0x27   : > { %p3678_p3 = pneg %p3677_p2 }
  0x28   : > { %3488 = dma.hbm_to_vmem [thread:$0]  (!%p3897_p0), %s4467_s6, 512, %s303_s28, [#allocation5], %s3761_s18, %s3761_s18, %s3762_s20  }
  0x29   : > { %p3685_p4 = pnand %p3684_p7, %p3678_p3 }
  0x2b   : > { %3688 = shalt.err (!%p3685_p4)
}
  0x2c   : > { %3491 = dma.hbm_to_vmem [thread:$0]  (!%p3897_p0), %s4455_s8, 512, %s319_s11, [#allocation8], %s3761_s18, %s3761_s18, %s3762_s20  }
  0x2d   : > { %p3213_p8 = scmp.ge.s32.totalorder %s3757_s16, 2 }
  0x2f   : > { %331 = sbr.rel (%p3213_p8) target bundleno = 68 (0x44), region = 44 }
  0x34   : > { %334 = sbr.rel (!%p3874_p5) target bundleno = 60 (0x3c), region = 48  ;;  %s336_s28 = sand.u32 (%p3874_p5), 1, %s3753_s15  }
  0x35   : > { %s3215_s21 = sshll.u32 (%p3874_p5), %s3757_s16, 3  ;;  %s3214_s27 = sshll.u32 (%p3874_p5), %s336_s28, 6 }
  0x36   : > { %s340_s29 = scalar_lea.vmem (%p3874_p5), %s4447_s0, %s3215_s21  ;;  %s338_s22 = scalar_lea.vmem (%p3874_p5), [#allocation2], %s3214_s27 }
  0x37   : > { %v383_v0 = vld [vmem:[%s340_s29] sm:$0xff] (%p3874_p5)  ;;  %v385_v1 = vld [vmem:[%s340_s29 + $0x10] sm:$0xff] (%p3874_p5) }
  0x38   : > { %v387_v2 = vld [vmem:[%s340_s29 + $0x20] sm:$0xff] (%p3874_p5)  ;;  %384 = vst [vmem:[%s338_s22] sm:$0xff] (%p3874_p5), %v383_v0  ;;  %386 = vst [vmem:[%s338_s22 + $0x8] sm:$0xff] (%p3874_p5), %v385_v1  ;;  %v389_v3 = vld [vmem:[%s340_s29 + $0x30] sm:$0xff] (%p3874_p5) }
  0x39   : > { %388 = vst [vmem:[%s338_s22 + $0x10] sm:$0xff] %v387_v2  ;;  %v391_v4 = vld [vmem:[%s340_s29 + $0x40] sm:$0xff]  ;;  %v393_v5 = vld [vmem:[%s340_s29 + $0x50] sm:$0xff]  ;;  %390 = vst [vmem:[%s338_s22 + $0x18] sm:$0xff] %v389_v3 }
  0x3a   : > { %392 = vst [vmem:[%s338_s22 + $0x20] sm:$0xff] %v391_v4  ;;  %394 = vst [vmem:[%s338_s22 + $0x28] sm:$0xff] %v393_v5  ;;  %v395_v6 = vld [vmem:[%s340_s29 + $0x60] sm:$0xff]  ;;  %v397_v7 = vld [vmem:[%s340_s29 + $0x70] sm:$0xff] }
  0x3b   : > { %396 = vst [vmem:[%s338_s22 + $0x30] sm:$0xff] %v395_v6  ;;  %398 = vst [vmem:[%s338_s22 + $0x38] sm:$0xff] %v397_v7 }
  0x3c PF: > { %411 = sbr.rel (!%p3874_p5) target bundleno = 68 (0x44), region = 90  ;;  %s413_s6 = sand.u32 (%p3874_p5), 1, %s3753_s15  }
  0x3d   : > { %s3217_s11 = sshll.u32 (%p3874_p5), %s3757_s16, 3  ;;  %s3216_s18 = sshll.u32 (%p3874_p5), %s413_s6, 6 }
  0x3e   : > { %s417_s28 = scalar_lea.vmem (%p3874_p5), %s4449_s2, %s3217_s11  ;;  %s415_s21 = scalar_lea.vmem (%p3874_p5), [#allocation3], %s3216_s18 }
  0x3f   : > { %v460_v8 = vld [vmem:[%s417_s28] sm:$0xff] (%p3874_p5)  ;;  %v462_v9 = vld [vmem:[%s417_s28 + $0x10] sm:$0xff] (%p3874_p5) }
  0x40   : > { %v464_v10 = vld [vmem:[%s417_s28 + $0x20] sm:$0xff] (%p3874_p5)  ;;  %461 = vst [vmem:[%s415_s21] sm:$0xff] (%p3874_p5), %v460_v8  ;;  %463 = vst [vmem:[%s415_s21 + $0x8] sm:$0xff] (%p3874_p5), %v462_v9  ;;  %v466_v11 = vld [vmem:[%s417_s28 + $0x30] sm:$0xff] (%p3874_p5) }
  0x41   : > { %465 = vst [vmem:[%s415_s21 + $0x10] sm:$0xff] %v464_v10  ;;  %v468_v12 = vld [vmem:[%s417_s28 + $0x40] sm:$0xff]  ;;  %v470_v13 = vld [vmem:[%s417_s28 + $0x50] sm:$0xff]  ;;  %467 = vst [vmem:[%s415_s21 + $0x18] sm:$0xff] %v466_v11 }
  0x42   : > { %469 = vst [vmem:[%s415_s21 + $0x20] sm:$0xff] %v468_v12  ;;  %471 = vst [vmem:[%s415_s21 + $0x28] sm:$0xff] %v470_v13  ;;  %v472_v14 = vld [vmem:[%s417_s28 + $0x60] sm:$0xff]  ;;  %v474_v15 = vld [vmem:[%s417_s28 + $0x70] sm:$0xff] }
  0x43   : > { %473 = vst [vmem:[%s415_s21 + $0x30] sm:$0xff] %v472_v14  ;;  %475 = vst [vmem:[%s415_s21 + $0x38] sm:$0xff] %v474_v15 }
  0x44 PF: > { %484 = sbr.rel (%p3889_p12) target bundleno = 1880 (0x758), region = 128  ;;  %s487_s23 = sand.u32 (!%p3889_p12), 1, %s3749_s14  }
  0x45   : > { %s3941_s27 = sshll.u32 (!%p3889_p12), %s487_s23, 6  ;;  %p4468_p5 = scmp.eq.s32.totalorder (!%p3889_p12), %s3856_s17, 0 }
  0x46   : > { %s489_s30 = scalar_lea.vmem (!%p3889_p12), [#allocation2], %s3941_s27  ;;  %s3945_s29 = scalar_lea.vmem (!%p3889_p12), [#allocation3], %s3941_s27 }
  0x49   : > { %3732 = dma.done.wait (%p4468_p5), [#allocation5], 512   ;;  %p4469_p6 = pmov %p4468_p5 }
  0x4a   : > { %p4470_p10 = pmov %p4468_p5 }
  0x4b   : > { %3734 = vsyncadd (%p4469_p6), [#allocation5], 4294966784 }
  0x4c   : > { %3736 = dma.done.wait (%p4470_p10), [#allocation8], 512   ;;  %p4471_p11 = pmov %p4468_p5 }
  0x4d   : > { %v3763_v16 = vmov 0   ;;  %vm559_vm0 = vcmask 261120   ;;  %v551_v17 = vld [vmem:[%s489_s30] sm:$0xff]  ;;  %v553_v18 = vld [vmem:[%s489_s30 + $0x10] sm:$0xff]  ;;  %v552_v19 = vld [vmem:[%s489_s30 + $0x8] sm:$0xff]  ;;  %p547_p12 = scmp.lt.s32.totalorder %s3856_s17, 1 }
  0x4e   : > { %3738 = vsyncadd (%p4471_p11), [#allocation8], 4294966784  ;;  %3553 = vset.pattern.permute.xlu1 %v3763_v16  ;;  %3554 = vset.pattern.permute.xlu0 %v3763_v16  ;;  %v560_v20 = vsel %vm559_vm0, %v551_v17, 0.0  ;;  %v566_v21 = vsel %vm559_vm0, %v553_v18, 0.0  ;;  %v554_v22 = vld [vmem:[%s489_s30 + $0x18] sm:$0xff]  ;;  %v563_v23 = vsel %vm559_vm0, %v552_v19, 0.0 }
  0x4f   : > { %561 = vadd.xlane.f32.xlu0 %v560_v20  ;;  %567 = vadd.xlane.f32.xlu1 %v566_v21  ;;  %v569_v24 = vsel %vm559_vm0, %v554_v22, 0.0  ;;  %v555_v25 = vld [vmem:[%s489_s30 + $0x20] sm:$0xff]  ;;  %v556_v26 = vld [vmem:[%s489_s30 + $0x28] sm:$0xff]  ;;  %v557_v29 = vld [vmem:[%s489_s30 + $0x30] sm:$0xff]  ;;  %s548_s26 = scalar_select %p547_p12, %s3856_s17, 1  ;;  %vm767_vm1 = vcmask 64512  }
  0x50   : > { %v572_v27 = vsel %vm559_vm0, %v555_v25, 0.0  ;;  %v575_v28 = vsel %vm559_vm0, %v556_v26, 0.0  ;;  %v3962_v30 = vld [vmem:[%s489_s30 + $0x38] sm:$0xff]  ;;  %v578_v31 = vsel %vm559_vm0, %v557_v29, 0.0  ;;  %v696_v35 = vld [vmem:[%s3945_s29] sm:$0xff]  ;;  %v698_v7 = vld [vmem:[%s3945_s29 + $0x10] sm:$0xff] }
  0x51   : > { %v581_v32 = vsel %vm559_vm0, %v3962_v30, 0.0  ;;  %s3224_s22 = sshll.u32 %s548_s26, 3  ;;  %v699_v8 = vld [vmem:[%s3945_s29 + $0x18] sm:$0xff]  ;;  %v697_v10 = vld [vmem:[%s3945_s29 + $0x8] sm:$0xff]  ;;  %v776_v11 = vld [vmem:[#allocation4 + $0x10] sm:$0xff]  ;;  %vm3765_vm2 = vmmov 0  }
  0x52   : > { %s550_s18 = scalar_lea.vmem %s4448_s1, %s3224_s22  ;;  %v777_v9 = vld [vmem:[#allocation4 + $0x18] sm:$0xff]  ;;  %v700_v12 = vld [vmem:[%s3945_s29 + $0x20] sm:$0xff]  ;;  %v775_v13 = vld [vmem:[#allocation4 + $0x8] sm:$0xff]  ;;  %s3766_s12 = smov 96   ;;  %vm2091_vm3 = vcmask 60416   ;;  %vm2853_vm4 = vcmask 130048  }
  0x53   : > { %564 = vadd.xlane.f32.xlu0 %v563_v23  ;;  %570 = vadd.xlane.f32.xlu1 %v569_v24  ;;  %v3971_v33 = vld [vmem:[%s550_s18] sm:$0xff]  ;;  %v701_v15 = vld [vmem:[%s3945_s29 + $0x28] sm:$0xff]  ;;  %v702_v16 = vld [vmem:[%s3945_s29 + $0x30] sm:$0xff]  ;;  %v3764_v23 = vmov 0.0   ;;  %s3767_s28 = smov 112   ;;  %s3768_s21 = smov 120  }
  0x54   : > { %v768_v34 = vsel %vm767_vm1, %v3971_v33, 0.0  ;;  %3344 = vmatprep.subr.mxu0 %v777_v9  ;;  %v774_v14 = vld [vmem:[#allocation4] sm:$0xff]  ;;  %3375 = vmatprep.subr.mxu1 %v3764_v23  ;;  %s3769_s30 = smov 88   ;;  %s3774_s26 = smov 16   ;;  %vm2855_vm5 = vcmask 195584  }
  0x55   : > { %3345 = vmatpush3.msra.mxu0 %v777_v9  ;;  %3377 = vmatprep.mubr.msk.f32.mxu1 %vm3765_vm2, %v3764_v23  ;;  %s3775_s22 = smov 8   ;;  %s3776_s6 = smov 24  }
  0x56   : > { %3346 = vmatprep.subr.mxu0 %v776_v11  ;;  %p4472_p1 = scmp.ne.s32.totalorder %s4463_s24, 0  ;;  %s3777_s11 = smov [#allocation9]  }
  0x57   : > { %573 = vadd.xlane.f32.xlu0 %v572_v27  ;;  %576 = vadd.xlane.f32.xlu1 %v575_v28  ;;  %s3693_s18 = sshll.u32 %s3777_s11, 4  ;;  %s3694_s18 = int_to_ptr.vmem [resolvable:$false] %s3693_s18 }
  0x58   : > { %3347 = vmatpush3.msra.mxu0 %v776_v11  ;;  %s3695_s20 = scalar_lea.vmem %s3694_s18, 2048 }
  0x59   : > { %3348 = vmatprep.subr.mxu0 %v775_v13 }
  0x5a   : > { %3349 = vmatpush3.msra.mxu0 %v775_v13 }
  0x5b   : > { %579 = vadd.xlane.f32.xlu0 %v578_v31  ;;  %582 = vadd.xlane.f32.xlu1 %v581_v32 }
  0x5c   : > { %3350 = vmatprep.subr.mxu0 %v774_v14 }
  0x5d   : > { %3351 = vmatpush3.msra.mxu0 %v774_v14  ;;  %v909_v14 = vld [vmem:[%s4452_s5 + $0x10] sm:$0xff] }
  0x5e   : > { %3364 = vmatprep.subr.mxu0 %v3764_v23 }
  0x5f   : > { %769 = vadd.xlane.f32.xlu0 %v768_v34 }
  0x6c   : > { %706 = vperm.xlu1 %3553, %v696_v35  }
  0xd8   : > { %v562_v36 = vpop.xlane.xlu0 %561  ;;  %v568_v37 = vpop.xlane.xlu1 %567 }
  0xd9   : > { %v585_v38 = vmul.f32 0.03125, %v562_v36  ;;  %v587_v39 = vmul.f32 0.03125, %v568_v37 }
  0xdb   : > { %v3976_v40 = vsub.f32 %v551_v17, %v585_v38  ;;  %v3978_v41 = vsub.f32 %v553_v18, %v587_v39 }
  0xdc   : > { %v565_v42 = vpop.xlane.xlu0 %564  ;;  %v571_v43 = vpop.xlane.xlu1 %570 }
  0xdd   : > { %v586_v44 = vmul.f32 0.03125, %v565_v42  ;;  %v588_v45 = vmul.f32 0.03125, %v571_v43  ;;  %v601_v46 = vmul.f32 %v3976_v40, %v3976_v40  ;;  %v603_v47 = vmul.f32 %v3978_v41, %v3978_v41 }
  0xdf   : > { %v3984_v48 = vsub.f32 %v552_v19, %v586_v44  ;;  %v3986_v49 = vsub.f32 %v554_v22, %v588_v45  ;;  %v609_v50 = vsel %vm559_vm0, %v601_v46, 0.0  ;;  %v615_v53 = vsel %vm559_vm0, %v603_v47, 0.0  ;;  %v703_v22 = vld [vmem:[%s3945_s29 + $0x38] sm:$0xff]  ;;  %s3770_s29 = smov 104  }
  0xe0   : > { %610 = vadd.xlane.f32.xlu0 %v609_v50  ;;  %v574_v51 = vpop.xlane.xlu0 %573  ;;  %v577_v52 = vpop.xlane.xlu1 %576 }
  0xe1   : > { %v589_v54 = vmul.f32 0.03125, %v574_v51  ;;  %v590_v55 = vmul.f32 0.03125, %v577_v52  ;;  %v602_v56 = vmul.f32 %v3984_v48, %v3984_v48  ;;  %v604_v57 = vmul.f32 %v3986_v49, %v3986_v49 }
  0xe3   : > { %v3994_v58 = vsub.f32 %v555_v25, %v589_v54  ;;  %v3996_v59 = vsub.f32 %v556_v26, %v590_v55  ;;  %v612_v60 = vsel %vm559_vm0, %v602_v56, 0.0  ;;  %v618_v63 = vsel %vm559_vm0, %v604_v57, 0.0  ;;  %v4033_v54 = vld [vmem:[%s4450_s3] ss:$0 sm:$0xff] }
  0xe4   : > { %616 = vadd.xlane.f32.xlu0 %v615_v53  ;;  %613 = vadd.xlane.f32.xlu1 %v612_v60  ;;  %v580_v61 = vpop.xlane.xlu0 %579  ;;  %v583_v17 = vpop.xlane.xlu1 %582  ;;  %v4039_v56 = vld [vmem:[%s4451_s4] ss:$0 sm:$0xff] }
  0xe5   : > { %v591_v62 = vmul.f32 0.03125, %v580_v61  ;;  %v605_v0 = vmul.f32 %v3994_v58, %v3994_v58  ;;  %v606_v1 = vmul.f32 %v3996_v59, %v3996_v59  ;;  %v592_v18 = vmul.f32 0.03125, %v583_v17 }
  0xe7   : > { %v4004_v2 = vsub.f32 %v557_v29, %v591_v62  ;;  %v621_v3 = vsel %vm559_vm0, %v605_v0, 0.0  ;;  %v624_v4 = vsel %vm559_vm0, %v606_v1, 0.0  ;;  %v4018_v19 = vsub.f32 %v3962_v30, %v592_v18 }
  0xe8   : > { %619 = vadd.xlane.f32.xlu1 %v618_v63  ;;  %622 = vadd.xlane.f32.xlu0 %v621_v3  ;;  %v4028_v24 = vpop.xlane.xlu0 %769  ;;  %v707_v25 = vpop.permute.xlu1 %706 }
  0xe9   : > { %v607_v5 = vmul.f32 %v4004_v2, %v4004_v2  ;;  %v608_v20 = vmul.f32 %v4018_v19, %v4018_v19 }
  0xeb   : > { %v627_v6 = vsel %vm559_vm0, %v607_v5, 0.0  ;;  %v630_v21 = vsel %vm559_vm0, %v608_v20, 0.0 }
  0xec   : > { %625 = vadd.xlane.f32.xlu1 %v624_v4  ;;  %628 = vadd.xlane.f32.xlu0 %v627_v6 }
  0xfd   : > { %716 = vperm.xlu1 %3553, %v698_v7  }
 0x101   : > { %721 = vperm.xlu1 %3553, %v699_v8  }
 0x102   : > { %711 = vperm.xlu0 %3554, %v697_v10  }
 0x105   : > { %726 = vperm.xlu1 %3553, %v700_v12  }
 0x109   : > { %731 = vperm.xlu1 %3553, %v701_v15  }
 0x10d   : > { %736 = vperm.xlu1 %3553, %v702_v16  }
 0x131   : > { %631 = vadd.xlane.f32.xlu1 %v630_v21 }
 0x142   : > { %741 = vperm.xlu1 %3553, %v703_v22  }
 0x169   : > { %v611_v26 = vpop.xlane.xlu0 %610 }
 0x16a   : > { %v633_v27 = vmul.f32 0.03125, %v611_v26 }
 0x16c   : > { %v641_v28 = vadd.f32 1e-05, %v633_v27 }
 0x16d   : > { %v614_v29 = vpop.xlane.xlu1 %613  ;;  %v617_v30 = vpop.xlane.xlu0 %616 }
 0x16e   : > { %3555 = vrsqrt.f32 %v641_v28  ;;  %v634_v31 = vmul.f32 0.03125, %v614_v29  ;;  %v635_v32 = vmul.f32 0.03125, %v617_v30 }
 0x170   : > { %v642_v34 = vadd.f32 1e-05, %v634_v31  ;;  %v643_v35 = vadd.f32 1e-05, %v635_v32  ;;  %v907_v31 = vld [vmem:[%s4452_s5] sm:$0xff] }
 0x171   : > { %v620_v36 = vpop.xlane.xlu1 %619  ;;  %v623_v37 = vpop.xlane.xlu0 %622 }
 0x172   : > { %3557 = vrsqrt.f32 %v642_v34  ;;  %v636_v38 = vmul.f32 0.03125, %v620_v36  ;;  %v637_v39 = vmul.f32 0.03125, %v623_v37 }
 0x173   : > { %3559 = vrsqrt.f32 %v643_v35 }
 0x174   : > { %v644_v42 = vadd.f32 1e-05, %v636_v38  ;;  %v645_v43 = vadd.f32 1e-05, %v637_v39 }
 0x175   : > { %v626_v44 = vpop.xlane.xlu1 %625  ;;  %v629_v45 = vpop.xlane.xlu0 %628 }
 0x176   : > { %3561 = vrsqrt.f32 %v644_v42  ;;  %v638_v46 = vmul.f32 0.03125, %v626_v44  ;;  %v639_v47 = vmul.f32 0.03125, %v629_v45 }
 0x177   : > { %3563 = vrsqrt.f32 %v645_v43 }
 0x178   : > { %v646_v50 = vadd.f32 1e-05, %v638_v46  ;;  %v647_v51 = vadd.f32 1e-05, %v639_v47 }
 0x179   : > { %v717_v52 = vpop.permute.xlu1 %716 }
 0x17a   : > { %3565 = vrsqrt.f32 %v646_v50 }
 0x17b   : > { %v3556_v53 = vpop.eup %3555  ;;  %3567 = vrsqrt.f32 %v647_v51 }
 0x17c   : > { %v657_v55 = vmul.f32 %v3556_v53, %v3976_v40 }
 0x17d   : > { %v722_v57 = vpop.permute.xlu1 %721  ;;  %v712_v7 = vpop.permute.xlu0 %711 }
 0x17e   : > { %v672_v60 = vmul.f32 %v4033_v54, %v657_v55 }
 0x17f   : > { %v3558_v61 = vpop.eup %3557 }
 0x180   : > { %v3560_v62 = vpop.eup %3559  ;;  %v687_v63 = vadd.f32 %v4039_v56, %v672_v60  ;;  %v658_v0 = vmul.f32 %v3558_v61, %v3984_v48  ;;  %v910_v48 = vld [vmem:[%s4452_s5 + $0x18] sm:$0xff] }
 0x181   : > { %v659_v1 = vmul.f32 %v3560_v62, %v3978_v41  ;;  %v727_v3 = vpop.permute.xlu1 %726 }
 0x182   : > { %v744_v4 = vmul.f32 %v707_v25, %v687_v63  ;;  %3352 = vmatprep.mubr.msk.f32.mxu0 %vm559_vm0, %v687_v63  ;;  %v673_v40 = vmul.f32 %v4033_v54, %v658_v0  ;;  %v908_v25 = vld [vmem:[%s4452_s5 + $0x8] sm:$0xff] }
 0x183   : > { %v3562_v5 = vpop.eup %3561  ;;  %v674_v6 = vmul.f32 %v4033_v54, %v659_v1 }
 0x184   : > { %v3564_v8 = vpop.eup %3563  ;;  %v660_v9 = vmul.f32 %v3562_v5, %v3986_v49  ;;  %v688_v10 = vadd.f32 %v4039_v56, %v673_v40  ;;  %v752_v21 = vsel %vm559_vm0, %v744_v4, 0.0 }
 0x185   : > { %v689_v41 = vadd.f32 %v4039_v56, %v674_v6  ;;  %v661_v11 = vmul.f32 %v3564_v8, %v3994_v58  ;;  %v732_v20 = vpop.permute.xlu1 %731 }
 0x186   : > { %v675_v12 = vmul.f32 %v4033_v54, %v660_v9  ;;  %v745_v13 = vmul.f32 %v712_v7, %v688_v10  ;;  %3353 = vmatmul.mubr.msk.f32.vlgmr.msra.gmra.mxu0 %vm559_vm0, %v688_v10 }
 0x187   : > { %v3566_v49 = vpop.eup %3565  ;;  %v746_v15 = vmul.f32 %v717_v52, %v689_v41  ;;  %v676_v16 = vmul.f32 %v4033_v54, %v661_v11  ;;  %3355 = vmatprep.mubr.msk.f32.mxu0 %vm559_vm0, %v689_v41  ;;  %3365 = vmatpush3.msra.mxu0 %v910_v48 }
 0x188   : > { %v3568_v17 = vpop.eup %3567  ;;  %v690_v18 = vadd.f32 %v4039_v56, %v675_v12  ;;  %v662_v58 = vmul.f32 %v3566_v49, %v3996_v59  ;;  %v753_v22 = vsel %vm559_vm0, %v745_v13, 0.0  ;;  %3366 = vmatprep.subr.mxu0 %v3764_v23 }
 0x189   : > { %v691_v26 = vadd.f32 %v4039_v56, %v676_v16  ;;  %v754_v27 = vadd.f32 %v753_v22, %v752_v21  ;;  %v663_v28 = vmul.f32 %v3568_v17, %v4004_v2  ;;  %3367 = vmatpush3.msra.mxu0 %v909_v14  ;;  %v755_v29 = vsel %vm559_vm0, %v746_v15, 0.0  ;;  %v737_v43 = vpop.permute.xlu1 %736 }
 0x18a   : > { %v747_v59 = vmul.f32 %v722_v57, %v690_v18  ;;  %v677_v30 = vmul.f32 %v4033_v54, %v662_v58  ;;  %3356 = vmatmul.mubr.msk.f32.gmra.mxu0 %vm559_vm0, %v690_v18  ;;  %3368 = vmatprep.subr.mxu0 %v3764_v23  ;;  %v771_v57 = vadd.f32 1e-10, %v4028_v24  ;;  %v3771_v14 = vmov 1983009808  }
 0x18b   : > { %v748_v32 = vmul.f32 %v727_v3, %v691_v26  ;;  %v756_v34 = vadd.f32 %v755_v29, %v754_v27  ;;  %v678_v35 = vmul.f32 %v4033_v54, %v663_v28  ;;  %3358 = vmatprep.mubr.msk.f32.mxu0 %vm559_vm0, %v691_v26  ;;  %3369 = vmatpush3.msra.mxu0 %v908_v25  ;;  %v998_v49 = vunpack.c.l.s4 %v3771_v14 }
 0x18c   : > { %v757_v2 = vsel %vm559_vm0, %v747_v59, 0.0  ;;  %v692_v36 = vadd.f32 %v4039_v56, %v677_v30  ;;  %3370 = vmatprep.subr.mxu0 %v3764_v23  ;;  %v1000_v15 = vlaneseq }
 0x18d   : > { %v758_v37 = vadd.f32 %v757_v2, %v756_v34  ;;  %v693_v38 = vadd.f32 %v4039_v56, %v678_v35  ;;  %3371 = vmatpush3.msra.mxu0 %v907_v31  ;;  %v759_v39 = vsel %vm559_vm0, %v748_v32, 0.0  ;;  %v999_v17 = vunpack.c.0.s8 %v998_v49 }
 0x18e   : > { %v749_v42 = vmul.f32 %v732_v20, %v692_v36  ;;  %3359 = vmatmul.mubr.msk.f32.gmra.mxu0 %vm559_vm0, %v692_v36  ;;  %3390 = vmatprep.subr.mxu0 %v3764_v23  ;;  %v4139_v18 = vshrl.u32 %v1000_v15, 7  ;;  %v3772_v20 = vmov 1934713408  }
 0x18f   : > { %v750_v44 = vmul.f32 %v737_v43, %v693_v38  ;;  %v760_v45 = vadd.f32 %v759_v39, %v758_v37  ;;  %3361 = vmatprep.mubr.msk.f32.mxu0 %vm559_vm0, %v693_v38  ;;  %v1030_v21 = vunpack.c.l.s4 %v3772_v20 }
 0x190   : > { %v761_v46 = vsel %vm559_vm0, %v749_v42, 0.0  ;;  %v4142_v26 = vsub.s32 %v999_v17, %v4139_v18 }
 0x191   : > { %v762_v47 = vadd.f32 %v761_v46, %v760_v45  ;;  %v763_v50 = vsel %vm559_vm0, %v750_v44, 0.0  ;;  %v1031_v29 = vunpack.c.0.s8 %v1030_v21 }
 0x193   : > { %v764_v51 = vadd.f32 %v763_v50, %v762_v47  ;;  %v4147_v35 = vsub.s32 %v1031_v29, %v4139_v18 }
 0x1ba   : > { %v632_v52 = vpop.xlane.xlu1 %631 }
 0x1bb   : > { %v640_v53 = vmul.f32 0.03125, %v632_v52 }
 0x1bd   : > { %v648_v55 = vadd.f32 1e-05, %v640_v53 }
 0x1be   : > { %v742_v0 = vpop.permute.xlu1 %741 }
 0x1bf   : > { %3569 = vrsqrt.f32 %v648_v55 }
 0x1c0   : > { %3571 = vrcp.f32 %v771_v57 }
 0x1cc   : > { %v3570_v60 = vpop.eup %3569 }
 0x1cd   : > { %v664_v61 = vmul.f32 %v3570_v60, %v4018_v19  ;;  %v3572_v40 = vpop.eup %3571 }
 0x1cf   : > { %v679_v62 = vmul.f32 %v4033_v54, %v664_v61 }
 0x1d1   : > { %v694_v63 = vadd.f32 %v4039_v56, %v679_v62 }
 0x1d3   : > { %v751_v1 = vmul.f32 %v742_v0, %v694_v63  ;;  %3362 = vmatmul.mubr.msk.f32.gmra.mxu0 %vm559_vm0, %v694_v63 }
 0x1d4   : > { %3372 = vmatprep.mubr.msk.f32.mxu0 %vm3765_vm2, %v3764_v23 }
 0x1d5   : > { %v765_v3 = vsel %vm559_vm0, %v751_v1, 0.0 }
 0x1d6   : > { %v766_v4 = vadd.f32 %v765_v3, %v764_v51 }
 0x1d8   : > { %v773_v24 = vmul.f32 %v3572_v40, %v766_v4 }
 0x1da   : > { %3373 = vmatmul.mubr.msk.f32.vlgmr.msra.gmra.mxu0 %vm559_vm0, %v773_v24 }
 0x1db   : > { %3392 = vmatprep.mubr.msk.f32.mxu0 %vm3765_vm2, %v3764_v23 }
 0x246   : > { %v4102_v19 = vpop.f32.mrf.mxu0 }
 0x247   : > { %1073 = vrot.lane.b32.xlu1 %v4102_v19, %s3766_s12 }
 0x248   : > { %v4105_v54 = vpop.f32.mrf.mxu0 }
 0x24a   : > { %v4107_v56 = vpop.f32.mrf.mxu0 }
 0x24b   : > { %1071 = vrot.lane.b32.xlu1 %v4105_v54, %s3766_s12 }
 0x24c   : > { %v4110_v5 = vpop.f32.mrf.mxu0 }
 0x24d   : > { %1075 = vrot.lane.b32.xlu0 %v4110_v5, %s3766_s12 }
 0x24e   : > { %v4113_v6 = vpop.f32.mrf.mxu0 }
 0x24f   : > { %1077 = vrot.lane.b32.xlu1 %v4107_v56, %s3766_s12 }
 0x250   : > { %v4116_v7 = vpop.f32.mrf.mxu0 }
 0x251   : > { %1079 = vrot.lane.b32.xlu0 %v4116_v7, %s3766_s12 }
 0x253   : > { %1081 = vrot.lane.b32.xlu1 %v4113_v6, %s3766_s12 }
 0x293   : > { %v4120_v8 = vpop.f32.mrf.mxu0 }
 0x294   : > { %1085 = vrot.lane.b32.xlu1 %v4120_v8, %s3766_s12 }
 0x295   : > { %v4123_v9 = vpop.f32.mrf.mxu0 }
 0x296   : > { %1083 = vrot.lane.b32.xlu0 %v4123_v9, %s3766_s12 }
 0x29a   : > { %v980_v10 = vpop.f32.mrf.mxu0 }
 0x29b   : > { %v4126_v48 = vmul.f32 0.35355338, %v980_v10 }
 0x29c   : > { %v3374_v41 = vpop.f32.mrf.mxu0 }
 0x29d   : > { %989 = vrot.lane.b32.xlu1 %v4126_v48, %s3767_s28  ;;  %986 = vrot.lane.b32.xlu0 %v4126_v48, %s3768_s21  ;;  %s546_s28 = scalar_lea.vmem [#allocation9], %s3941_s27  ;;  %s3280_s27 = sshll.u32 %s3856_s17, 7 }
 0x29e   : > { %s3089_s21 = sshll.u32 %s546_s28, 4  ;;  %s4405_s17 = scalar_lea.sflag [#allocation6], %s487_s23  ;;  %s4393_s21 = int_to_ptr.vmem [resolvable:$true] %s3089_s21 }
 0x29f   : > { %p3696_p2 = scmp.lt.s32.totalorder %s4393_s21, %s3694_s18 }
 0x2a1   : > { %1233 = vrot.lane.b32.xlu1 %v4102_v19, %s3769_s30  ;;  %992 = vrot.lane.b32.xlu0 %v4126_v48, %s3770_s29 }
 0x2a5   : > { %1235 = vrot.lane.b32.xlu1 %v4110_v5, %s3769_s30  ;;  %1231 = vrot.lane.b32.xlu0 %v4105_v54, %s3769_s30 }
 0x2a9   : > { %1237 = vrot.lane.b32.xlu0 %v4107_v56, %s3769_s30 }
 0x2b9   : > { %v1074_v11 = vpop.permute.xlu1 %1073 }
 0x2bd   : > { %v1072_v12 = vpop.permute.xlu1 %1071 }
 0x2bf   : > { %v1076_v16 = vpop.permute.xlu0 %1075 }
 0x2c0   : > { %v1095_v27 = vcombine.low %v1072_v12, %v1076_v16  ;;  %v1096_v45 = vcombine.high %v1072_v12, %v1076_v16 }
 0x2c1   : > { %v1078_v13 = vpop.permute.xlu1 %1077 }
 0x2c2   : > { %v1111_v22 = vcombine.low %v1074_v11, %v1078_v13  ;;  %v1103_v32 = vrot.slane %v1095_v27, %v4142_v26  ;;  %v1112_v38 = vcombine.high %v1074_v11, %v1078_v13  ;;  %v1110_v0 = vrot.slane %v1096_v45, %v4142_v26 }
 0x2c3   : > { %v1080_v25 = vpop.permute.xlu0 %1079 }
 0x2c4   : > { %v1119_v59 = vrot.slane %v1111_v22, %v4142_v26  ;;  %v1126_v55 = vrot.slane %v1112_v38, %v4142_v26 }
 0x2c5   : > { %v1082_v58 = vpop.permute.xlu1 %1081 }
 0x2c6   : > { %v1160_v2 = vcombine.high %v1103_v32, %v1119_v59  ;;  %v1159_v39 = vcombine.low %v1103_v32, %v1119_v59  ;;  %v1175_v41 = vcombine.low %v1110_v0, %v1126_v55  ;;  %v1176_v49 = vcombine.high %v1110_v0, %v1126_v55 }
 0x2c8   : > { %v4152_v46 = vrot.slane %v1160_v2, %v4147_v35  ;;  %v1167_v61 = vrot.slane %v1159_v39, %v4147_v35  ;;  %v1190_v59 = vrot.slane %v1176_v49, %v4147_v35  ;;  %v1445_v49 = vsub.s32 0, %v4139_v18 }
 0x306   : > { %v1086_v28 = vpop.permute.xlu1 %1085 }
 0x307   : > { %v1143_v30 = vcombine.low %v1082_v58, %v1086_v28  ;;  %v1144_v47 = vcombine.high %v1082_v58, %v1086_v28 }
 0x308   : > { %v1084_v31 = vpop.permute.xlu0 %1083 }
 0x309   : > { %v1127_v34 = vcombine.low %v1080_v25, %v1084_v31  ;;  %v1151_v36 = vrot.slane %v1143_v30, %v4142_v26  ;;  %v1128_v42 = vcombine.high %v1080_v25, %v1084_v31  ;;  %v1158_v1 = vrot.slane %v1144_v47, %v4142_v26 }
 0x30a   : > { %v1183_v25 = vrot.slane %v1175_v41, %v4147_v35 }
 0x30b   : > { %v1135_v37 = vrot.slane %v1127_v34, %v4142_v26  ;;  %v1142_v57 = vrot.slane %v1128_v42, %v4142_v26 }
 0x30d   : > { %v1191_v43 = vcombine.low %v1135_v37, %v1151_v36  ;;  %v1192_v44 = vcombine.high %v1135_v37, %v1151_v36  ;;  %v1207_v11 = vcombine.low %v1142_v57, %v1158_v1  ;;  %v1208_v17 = vcombine.high %v1142_v57, %v1158_v1 }
 0x30e   : > { %v3773_v1 = vmov 1966171168  }
 0x30f   : > { %v4155_v50 = vrot.slane %v1192_v44, %v4147_v35  ;;  %v990_v51 = vpop.permute.xlu1 %989  ;;  %v987_v52 = vpop.permute.xlu0 %986  ;;  %v1199_v53 = vrot.slane %v1191_v43, %v4147_v35  ;;  %v1215_v22 = vrot.slane %v1207_v11, %v4147_v35  ;;  %v1222_v2 = vrot.slane %v1208_v17, %v4147_v35 }
 0x310   : > { %v995_v62 = vcombine.low %v4126_v48, %v990_v51  ;;  %v996_v63 = vcombine.high %v4126_v48, %v990_v51 }
 0x311   : > { %v1226_v60 = vcombine.high %v4152_v46, %v4155_v50  ;;  %v1223_v4 = vcombine.low %v1167_v61, %v1199_v53  ;;  %v1224_v30 = vcombine.high %v1167_v61, %v1199_v53  ;;  %v1225_v39 = vcombine.low %v4152_v46, %v4155_v50 }
 0x312   : > { %v1003_v12 = vrot.slane %v995_v62, %v4142_v26  ;;  %v1010_v48 = vrot.slane %v996_v63, %v4142_v26  ;;  %v1228_v42 = vcombine.high %v1183_v25, %v1215_v22  ;;  %v1230_v57 = vcombine.high %v1190_v59, %v1222_v2 }
 0x313   : > { %v1234_v3 = vpop.permute.xlu1 %1233  ;;  %3391 = vmatpush3.xpose.msk.msra.mxu0 %vm767_vm1, %v1226_v60  ;;  %v993_v40 = vpop.permute.xlu0 %992  ;;  %3376 = vmatpush3.xpose.msk.msra.mxu1 %vm767_vm1, %v1223_v4  ;;  %v1227_v62 = vcombine.low %v1183_v25, %v1215_v22  ;;  %v1229_v0 = vcombine.low %v1190_v59, %v1222_v2  ;;  %v3236_v4 = vadd.f32 -1.0, %v3971_v33 }
 0x314   : > { %v1011_v24 = vcombine.low %v987_v52, %v993_v40  ;;  %v1012_v10 = vcombine.high %v987_v52, %v993_v40  ;;  %3400 = vmatprep.subr.mxu0 %v3764_v23  ;;  %3380 = vmatprep.subr.mxu1 %v3764_v23 }
 0x316   : > { %v1019_v13 = vrot.slane %v1011_v24, %v4142_v26  ;;  %v1026_v14 = vrot.slane %v1012_v10, %v4142_v26  ;;  %v1392_v24 = vmul.f32 1e+09, %v3236_v4 }
 0x317   : > { %v1236_v15 = vpop.permute.xlu1 %1235  ;;  %v1232_v16 = vpop.permute.xlu0 %1231 }
 0x318   : > { %v1027_v58 = vcombine.low %v1003_v12, %v1019_v13  ;;  %v1028_v20 = vcombine.high %v1003_v12, %v1019_v13  ;;  %v1043_v21 = vcombine.low %v1010_v48, %v1026_v14  ;;  %v1255_v28 = vcombine.low %v1232_v16, %v1236_v15 }
 0x319   : > { %v1044_v31 = vcombine.high %v1010_v48, %v1026_v14  ;;  %v1256_v32 = vcombine.high %v1232_v16, %v1236_v15  ;;  %v1394_v11 = vcombine.high %v1392_v24, %v1392_v24 }
 0x31a   : > { %v1042_v27 = vrot.slane %v1028_v20, %v4147_v35  ;;  %v1035_v29 = vrot.slane %v1027_v58, %v4147_v35  ;;  %v1051_v36 = vrot.slane %v1043_v21, %v4147_v35  ;;  %v4190_v44 = vrot.slane %v1255_v28, %v4142_v26 }
 0x31b   : > { %v1238_v34 = vpop.permute.xlu0 %1237  ;;  %v1058_v46 = vrot.slane %v1044_v31, %v4147_v35  ;;  %v4200_v50 = vrot.slane %v1256_v32, %v4142_v26 }
 0x31c   : > { %v1060_v37 = vcombine.high %v1042_v27, %v3764_v23  ;;  %v1271_v38 = vcombine.low %v1234_v3, %v1238_v34  ;;  %3378 = vmatmul.mubr.msk.f32.vlgmr.msra.gmra.mxu1 %vm767_vm1, %v1035_v29  ;;  %v1272_v43 = vcombine.high %v1234_v3, %v1238_v34  ;;  %v1059_v47 = vcombine.high %v1035_v29, %v3764_v23 }
 0x31d   : > { %3381 = vmatpush3.xpose.msk.msra.mxu1 %vm767_vm1, %v1224_v30  ;;  %3382 = vmatprep.mubr.msk.f32.mxu1 %vm3765_vm2, %v3764_v23  ;;  %v1061_v52 = vcombine.high %v1051_v36, %v3764_v23  ;;  %v1062_v63 = vcombine.high %v1058_v46, %v3764_v23  ;;  %v1396_v3 = vunpack.c.l.s4 %v3773_v1 }
 0x31e   : > { %v4193_v45 = vrot.slane %v1271_v38, %v4142_v26  ;;  %3393 = vmatmul.mubr.msk.f32.vlgmr.msra.gmra.mxu0 %vm767_vm1, %v1060_v37  ;;  %3385 = vmatprep.subr.mxu1 %v3764_v23  ;;  %v4203_v51 = vrot.slane %v1272_v43, %v4142_v26 }
 0x31f   : > { %3401 = vmatpush3.xpose.msk.msra.mxu0 %vm767_vm1, %v1228_v42  ;;  %3402 = vmatprep.mubr.msk.f32.mxu0 %vm3765_vm2, %v3764_v23  ;;  %v1397_v40 = vunpack.c.0.s8 %v1396_v3 }
 0x320   : > { %v1319_v53 = vcombine.low %v4190_v44, %v4193_v45  ;;  %v1320_v55 = vcombine.high %v4190_v44, %v4193_v45  ;;  %3383 = vmatmul.mubr.msk.f32.vlgmr.msra.gmra.mxu1 %vm767_vm1, %v1059_v47  ;;  %3410 = vmatprep.subr.mxu0 %v3764_v23  ;;  %v1335_v60 = vcombine.low %v4200_v50, %v4203_v51 }
 0x321   : > { %v1336_v61 = vcombine.high %v4200_v50, %v4203_v51  ;;  %3386 = vmatpush3.xpose.msk.msra.mxu1 %vm767_vm1, %v1225_v39  ;;  %3387 = vmatprep.mubr.msk.f32.mxu1 %vm3765_vm2, %v3764_v23  ;;  %v1400_v10 = vsub.s32 %v1397_v40, %v4139_v18 }
 0x322   : > { %3403 = vmatmul.mubr.msk.f32.vlgmr.msra.gmra.mxu0 %vm767_vm1, %v1061_v52  ;;  %3395 = vmatprep.subr.mxu1 %v3764_v23  ;;  %v1343_v44 = vrot.slane %v1335_v60, %v4147_v35 }
 0x323   : > { %3411 = vmatpush3.xpose.msk.msra.mxu0 %vm767_vm1, %v1230_v57  ;;  %3412 = vmatprep.mubr.msk.f32.mxu0 %vm3765_vm2, %v3764_v23  ;;  %v1401_v41 = vrot.slane %v1392_v24, %v1400_v10  ;;  %v1408_v48 = vrot.slane %v1394_v11, %v1400_v10 }
 0x324   : > { %3388 = vmatmul.mubr.msk.f32.vlgmr.msra.gmra.mxu1 %vm767_vm1, %v1042_v27  ;;  %3420 = vmatprep.subr.mxu0 %v3764_v23 }
 0x325   : > { %3396 = vmatpush3.xpose.msk.msra.mxu1 %vm767_vm1, %v1227_v62  ;;  %3397 = vmatprep.mubr.msk.f32.mxu1 %vm3765_vm2, %v3764_v23  ;;  %v1409_v12 = vcombine.high %v1401_v41, %v1401_v41  ;;  %v1417_v14 = vrot.slane %v1401_v41, %v1400_v10  ;;  %v1410_v16 = vcombine.high %v1408_v48, %v1408_v48 }
 0x326   : > { %3413 = vmatmul.mubr.msk.f32.vlgmr.msra.gmra.mxu0 %vm767_vm1, %v1062_v63  ;;  %3405 = vmatprep.subr.mxu1 %v3764_v23 }
 0x327   : > { %3422 = vmatprep.mubr.msk.f32.mxu0 %vm3765_vm2, %v3764_v23  ;;  %v1431_v13 = vrot.slane %v1409_v12, %v1400_v10  ;;  %v1446_v17 = vrot.slane %v1417_v14, %v1445_v49  ;;  %v1438_v20 = vrot.slane %v1410_v16, %v1400_v10  ;;  %v1439_v25 = vcombine.high %v1417_v14, %v1417_v14 }
 0x328   : > { %3398 = vmatmul.mubr.msk.f32.vlgmr.msra.gmra.mxu1 %vm767_vm1, %v1051_v36  ;;  %v1424_v36 = vrot.slane %v1408_v48, %v1400_v10 }
 0x329   : > { %3406 = vmatpush3.xpose.msk.msra.mxu1 %vm767_vm1, %v1229_v0  ;;  %3407 = vmatprep.mubr.msk.f32.mxu1 %vm3765_vm2, %v3764_v23  ;;  %v1441_v15 = vcombine.high %v1431_v13, %v1431_v13  ;;  %v1450_v22 = vrot.slane %v1431_v13, %v1445_v49  ;;  %v1466_v30 = vrot.slane %v1438_v20, %v1445_v49 }
 0x32a   : > { %3415 = vmatprep.subr.mxu1 %v3764_v23  ;;  %v1442_v31 = vcombine.high %v1438_v20, %v1438_v20  ;;  %v1454_v2 = vrot.slane %v1439_v25, %v1445_v49  ;;  %v1462_v62 = vrot.slane %v1424_v36, %v1445_v49  ;;  %v1440_v63 = vcombine.high %v1424_v36, %v1424_v36 }
 0x32b   : > { %v1458_v58 = vrot.slane %v1441_v15, %v1445_v49 }
 0x32c   : > { %3408 = vmatmul.mubr.msk.f32.vlgmr.msra.gmra.mxu1 %vm767_vm1, %v1058_v46  ;;  %v1474_v47 = vrot.slane %v1442_v31, %v1445_v49  ;;  %v1470_v11 = vrot.slane %v1440_v63, %v1445_v49 }
 0x32d   : > { %3417 = vmatprep.mubr.msk.f32.mxu1 %vm3765_vm2, %v3764_v23 }
 0x3dc   : > { %v1555_v21 = vpop.f32.mrf.mxu1 }
 0x3dd   : > { %v1556_v33 = vadd.f32 %v1555_v21, %v1446_v17 }
 0x3de   : > { %v3379_v27 = vpop.f32.mrf.mxu1  ;;  %v1783_v28 = vpop.f32.mrf.mxu0 }
 0x3df   : > { %v1784_v29 = vadd.f32 %v1783_v28, %v1458_v58  ;;  %v2092_v59 = vsel %vm2091_vm3, %v1556_v33, -inf }
 0x3e0   : > { %v3394_v32 = vpop.f32.mrf.mxu0  ;;  %2093 = vmax.xlane.f32.xlu1 %v2092_v59  ;;  %v1631_v18 = vpop.f32.mrf.mxu1 }
 0x3e1   : > { %v1632_v34 = vadd.f32 %v1631_v18, %v1450_v22  ;;  %v2101_v42 = vsel %vm2091_vm3, %v1784_v29, -inf }
 0x3e2   : > { %v3384_v37 = vpop.f32.mrf.mxu1  ;;  %v1935_v38 = vpop.f32.mrf.mxu0 }
 0x3e3   : > { %v1936_v39 = vadd.f32 %v1935_v38, %v1466_v30  ;;  %v2095_v43 = vsel %vm2091_vm3, %v1632_v34, -inf }
 0x3e4   : > { %v3404_v46 = vpop.f32.mrf.mxu0  ;;  %2102 = vmax.xlane.f32.xlu1 %v2101_v42  ;;  %2096 = vmax.xlane.f32.xlu0 %v2095_v43  ;;  %v1707_v52 = vpop.f32.mrf.mxu1 }
 0x3e5   : > { %v1708_v57 = vadd.f32 %v1707_v52, %v1454_v2  ;;  %v2107_v4 = vsel %vm2091_vm3, %v1936_v39, -inf }
 0x3e6   : > { %v3389_v0 = vpop.f32.mrf.mxu1  ;;  %v2087_v1 = vpop.f32.mrf.mxu0 }
 0x3e7   : > { %v2088_v3 = vadd.f32 %v2087_v1, %v1474_v47  ;;  %v2098_v40 = vsel %vm2091_vm3, %v1708_v57, -inf }
 0x3e8   : > { %v3414_v24 = vpop.f32.mrf.mxu0  ;;  %2108 = vmax.xlane.f32.xlu1 %v2107_v4  ;;  %2099 = vmax.xlane.f32.xlu0 %v2098_v40  ;;  %v1859_v10 = vpop.f32.mrf.mxu1 }
 0x3e9   : > { %v1860_v41 = vadd.f32 %v1859_v10, %v1462_v62  ;;  %v2113_v48 = vsel %vm2091_vm3, %v2088_v3, -inf }
 0x3ea   : > { %v3399_v12 = vpop.f32.mrf.mxu1 }
 0x3eb   : > { %v2104_v13 = vsel %vm2091_vm3, %v1860_v41, -inf }
 0x3ec   : > { %2114 = vmax.xlane.f32.xlu1 %v2113_v48  ;;  %2105 = vmax.xlane.f32.xlu0 %v2104_v13  ;;  %v2011_v14 = vpop.f32.mrf.mxu1 }
 0x3ed   : > { %v2012_v15 = vadd.f32 %v2011_v14, %v1470_v11 }
 0x3ee   : > { %v3409_v16 = vpop.f32.mrf.mxu1 }
 0x3ef   : > { %v2110_v17 = vsel %vm2091_vm3, %v2012_v15, -inf }
 0x3f0   : > { %2111 = vmax.xlane.f32.xlu0 %v2110_v17 }
 0x3fd   : > { %1239 = vrot.lane.b32.xlu1 %v4116_v7, %s3769_s30 }
 0x406   : > { %1241 = vrot.lane.b32.xlu0 %v4113_v6, %s3769_s30 }
 0x469   : > { %v2094_v49 = vpop.xlane.xlu1 %2093 }
 0x46a   : > { %v2116_v58 = vsub.f32 %v1556_v33, %v2094_v49 }
 0x46c   : > { %v2124_v20 = vmul.f32 1.442695, %v2116_v58 }
 0x46d   : > { %v2103_v21 = vpop.xlane.xlu1 %2102  ;;  %v2097_v22 = vpop.xlane.xlu0 %2096 }
 0x46e   : > { %3573 = vpow2.f32 %v2124_v20  ;;  %v2119_v25 = vsub.f32 %v1784_v29, %v2103_v21  ;;  %v2117_v27 = vsub.f32 %v1632_v34, %v2097_v22 }
 0x470   : > { %v2130_v28 = vmul.f32 1.442695, %v2119_v25  ;;  %v2126_v59 = vmul.f32 1.442695, %v2117_v27 }
 0x471   : > { %v2109_v30 = vpop.xlane.xlu1 %2108  ;;  %v2100_v31 = vpop.xlane.xlu0 %2099 }
 0x472   : > { %3575 = vpow2.f32 %v2130_v28  ;;  %v2121_v32 = vsub.f32 %v1936_v39, %v2109_v30  ;;  %v2118_v18 = vsub.f32 %v1708_v57, %v2100_v31 }
 0x473   : > { %3577 = vpow2.f32 %v2126_v59 }
 0x474   : > { %v2134_v2 = vmul.f32 1.442695, %v2121_v32  ;;  %v2128_v36 = vmul.f32 1.442695, %v2118_v18 }
 0x475   : > { %v2115_v37 = vpop.xlane.xlu1 %2114  ;;  %v2106_v38 = vpop.xlane.xlu0 %2105 }
 0x476   : > { %v2123_v42 = vsub.f32 %v2088_v3, %v2115_v37  ;;  %v2120_v33 = vsub.f32 %v1860_v41, %v2106_v38  ;;  %3579 = vpow2.f32 %v2128_v36 }
 0x477   : > { %3581 = vpow2.f32 %v2134_v2 }
 0x478   : > { %v2138_v43 = vmul.f32 1.442695, %v2123_v42  ;;  %v2132_v47 = vmul.f32 1.442695, %v2120_v33 }
 0x479   : > { %v2112_v29 = vpop.xlane.xlu0 %2111  ;;  %v1240_v13 = vpop.permute.xlu1 %1239 }
 0x47a   : > { %v2122_v34 = vsub.f32 %v2012_v15, %v2112_v29  ;;  %3583 = vpow2.f32 %v2132_v47 }
 0x47b   : > { %v4260_v46 = vpop.eup %3573  ;;  %3585 = vpow2.f32 %v2138_v43  ;;  %v1327_v43 = vrot.slane %v1319_v53, %v4147_v35 }
 0x47c   : > { %v2136_v52 = vmul.f32 1.442695, %v2122_v34  ;;  %v2140_v39 = vsel %vm2091_vm3, %v4260_v46, 0.0 }
 0x47d   : > { %2141 = vadd.xlane.f32.xlu0 %v2140_v39  ;;  %v1242_v14 = vpop.permute.xlu0 %1241 }
 0x47e   : > { %3587 = vpow2.f32 %v2136_v52 }
 0x47f   : > { %v4264_v57 = vpop.eup %3575 }
 0x480   : > { %v2149_v62 = vsel %vm2091_vm3, %v4264_v57, 0.0  ;;  %v3578_v63 = vpop.eup %3577 }
 0x481   : > { %2150 = vadd.xlane.f32.xlu1 %v2149_v62  ;;  %v2143_v1 = vsel %vm2091_vm3, %v3578_v63, 0.0  ;;  %v1334_v62 = vrot.slane %v1320_v55, %v4147_v35 }
 0x483   : > { %v4268_v0 = vpop.eup %3579 }
 0x484   : > { %v4271_v3 = vpop.eup %3581  ;;  %v2146_v4 = vsel %vm2091_vm3, %v4268_v0, 0.0 }
 0x485   : > { %2144 = vadd.xlane.f32.xlu1 %v2143_v1  ;;  %2147 = vadd.xlane.f32.xlu0 %v2146_v4  ;;  %v2155_v24 = vsel %vm2091_vm3, %v4271_v3, 0.0 }
 0x487   : > { %v4275_v40 = vpop.eup %3583 }
 0x488   : > { %v4279_v10 = vpop.eup %3585  ;;  %v2152_v41 = vsel %vm2091_vm3, %v4275_v40, 0.0 }
 0x489   : > { %2156 = vadd.xlane.f32.xlu1 %v2155_v24  ;;  %2153 = vadd.xlane.f32.xlu0 %v2152_v41  ;;  %v2161_v12 = vsel %vm2091_vm3, %v4279_v10, 0.0 }
 0x48b   : > { %v4283_v11 = vpop.eup %3587 }
 0x48c   : > { %v2158_v48 = vsel %vm2091_vm3, %v4283_v11, 0.0 }
 0x48d   : > { %2162 = vadd.xlane.f32.xlu1 %v2161_v12  ;;  %2159 = vadd.xlane.f32.xlu0 %v2158_v48 }
 0x49e   : > { %1243 = vrot.lane.b32.xlu1 %v4123_v9, %s3769_s30 }
 0x4a3   : > { %1245 = vrot.lane.b32.xlu0 %v4120_v8, %s3769_s30 }
 0x506   : > { %v2142_v16 = vpop.xlane.xlu0 %2141 }
 0x507   : > { %3589 = vrcp.f32 %v2142_v16 }
 0x50a   : > { %v2151_v15 = vpop.xlane.xlu1 %2150 }
 0x50e   : > { %v2145_v17 = vpop.xlane.xlu1 %2144  ;;  %v2148_v49 = vpop.xlane.xlu0 %2147 }
 0x50f   : > { %3591 = vrcp.f32 %v2145_v17 }
 0x510   : > { %3593 = vrcp.f32 %v2151_v15 }
 0x511   : > { %3595 = vrcp.f32 %v2148_v49 }
 0x512   : > { %v2157_v58 = vpop.xlane.xlu1 %2156  ;;  %v2154_v20 = vpop.xlane.xlu0 %2153 }
 0x513   : > { %3597 = vrcp.f32 %v2157_v58 }
 0x514   : > { %3599 = vrcp.f32 %v2154_v20  ;;  %v3590_v42 = vpop.eup %3589 }
 0x515   : > { %v2180_v1 = vmul.f32 %v3590_v42, %v4260_v46 }
 0x516   : > { %v2163_v21 = vpop.xlane.xlu1 %2162  ;;  %v2160_v22 = vpop.xlane.xlu0 %2159 }
 0x517   : > { %3601 = vrcp.f32 %v2163_v21 }
 0x518   : > { %3603 = vrcp.f32 %v2160_v22 }
 0x51a   : > { %v1244_v25 = vpop.permute.xlu1 %1243  ;;  %v1246_v59 = vpop.permute.xlu0 %1245 }
 0x51b   : > { %v1287_v27 = vcombine.low %v1240_v13, %v1244_v25  ;;  %v1288_v28 = vcombine.high %v1240_v13, %v1244_v25  ;;  %v1303_v30 = vcombine.low %v1242_v14, %v1246_v59  ;;  %v1304_v31 = vcombine.high %v1242_v14, %v1246_v59 }
 0x51c   : > { %v3592_v33 = vpop.eup %3591 }
 0x51d   : > { %v1295_v32 = vrot.slane %v1287_v27, %v4142_v26  ;;  %v1311_v18 = vrot.slane %v1303_v30, %v4142_v26  ;;  %v1302_v2 = vrot.slane %v1288_v28, %v4142_v26  ;;  %v1318_v36 = vrot.slane %v1304_v31, %v4142_v26  ;;  %v3594_v24 = vpop.eup %3593 }
 0x51e   : > { %v2181_v4 = vmul.f32 %v3592_v33, %v3578_v63  ;;  %v3596_v53 = vpop.eup %3595  ;;  %v2183_v46 = vmul.f32 %v3594_v24, %v4264_v57 }
 0x51f   : > { %v1351_v37 = vcombine.low %v1295_v32, %v1311_v18  ;;  %v1352_v38 = vcombine.high %v1295_v32, %v1311_v18  ;;  %v1367_v34 = vcombine.low %v1302_v2, %v1318_v36  ;;  %v1368_v41 = vcombine.high %v1302_v2, %v1318_v36  ;;  %v2931_v18 = vld [vmem:[#allocation7 + $0x18] sm:$0xff] }
 0x520   : > { %v3598_v45 = vpop.eup %3597  ;;  %v2182_v55 = vmul.f32 %v3596_v53, %v4268_v0  ;;  %v1350_v0 = vrot.slane %v1336_v61, %v4147_v35 }
 0x521   : > { %v1359_v47 = vrot.slane %v1351_v37, %v4147_v35  ;;  %v1366_v29 = vrot.slane %v1352_v38, %v4147_v35  ;;  %v1375_v12 = vrot.slane %v1367_v34, %v4147_v35  ;;  %v3600_v63 = vpop.eup %3599  ;;  %v1382_v14 = vrot.slane %v1368_v41, %v4147_v35  ;;  %v2928_v34 = vld [vmem:[#allocation7] sm:$0xff] }
 0x522   : > { %v2184_v16 = vmul.f32 %v3600_v63, %v4275_v40  ;;  %v2185_v17 = vmul.f32 %v3598_v45, %v4271_v3 }
 0x523   : > { %v1383_v52 = vcombine.low %v1327_v43, %v1359_v47  ;;  %v1384_v39 = vcombine.high %v1327_v43, %v1359_v47  ;;  %v1385_v48 = vcombine.low %v1334_v62, %v1366_v29  ;;  %v1386_v13 = vcombine.high %v1334_v62, %v1366_v29  ;;  %v2929_v29 = vld [vmem:[#allocation7 + $0x8] sm:$0xff] }
 0x524   : > { %v1387_v60 = vcombine.low %v1343_v44, %v1375_v12  ;;  %v1388_v15 = vcombine.high %v1343_v44, %v1375_v12  ;;  %v3602_v57 = vpop.eup %3601  ;;  %v1389_v50 = vcombine.low %v1350_v0, %v1382_v14  ;;  %v1390_v51 = vcombine.high %v1350_v0, %v1382_v14 }
 0x525   : > { %3416 = vmatpush3.msra.mxu1 %v1383_v52  ;;  %3421 = vmatpush3.msra.mxu0 %v1384_v39  ;;  %v3604_v49 = vpop.eup %3603  ;;  %v2187_v3 = vmul.f32 %v3602_v57, %v4279_v10  ;;  %v2930_v10 = vld [vmem:[#allocation7 + $0x10] sm:$0xff] }
 0x526   : > { %3418 = vmatmul.mubr.msk.f32.vlgmr.msra.gmra.mxu1 %vm767_vm1, %v2180_v1  ;;  %3423 = vmatmul.mubr.msk.f32.vlgmr.msra.gmra.mxu0 %vm767_vm1, %v2181_v4  ;;  %v2186_v61 = vmul.f32 %v3604_v49, %v4283_v11 }
 0x527   : > { %3425 = vmatprep.subr.mxu1 %v3764_v23  ;;  %3430 = vmatprep.subr.mxu0 %v3764_v23 }
 0x528   : > { %3426 = vmatpush3.msra.mxu1 %v1385_v48  ;;  %3431 = vmatpush3.msra.mxu0 %v1386_v13 }
 0x529   : > { %3427 = vmatprep.mubr.msk.f32.mxu1 %vm3765_vm2, %v3764_v23  ;;  %3432 = vmatprep.mubr.msk.f32.mxu0 %vm3765_vm2, %v3764_v23 }
 0x52a   : > { %3435 = vmatprep.subr.mxu1 %v3764_v23  ;;  %3440 = vmatprep.subr.mxu0 %v3764_v23 }
 0x52b   : > { %3428 = vmatmul.mubr.msk.f32.vlgmr.msra.gmra.mxu1 %vm767_vm1, %v2182_v55  ;;  %3433 = vmatmul.mubr.msk.f32.vlgmr.msra.gmra.mxu0 %vm767_vm1, %v2183_v46  ;;  %v3261_v55 = vld [vmem:[%s4454_s7] ss:$0 sm:$0xff] }
 0x52c   : > { %3436 = vmatpush3.msra.mxu1 %v1387_v60  ;;  %3441 = vmatpush3.msra.mxu0 %v1388_v15  ;;  %v2865_v46 = vadd.f32 %v4102_v19, %v3261_v55  ;;  %v2866_v63 = vadd.f32 %v3261_v55, %v4110_v5  ;;  %v2867_v15 = vadd.f32 %v4107_v56, %v3261_v55 }
 0x52d   : > { %3437 = vmatprep.mubr.msk.f32.mxu1 %vm3765_vm2, %v3764_v23  ;;  %3442 = vmatprep.mubr.msk.f32.mxu0 %vm3765_vm2, %v3764_v23  ;;  %v2868_v57 = vadd.f32 %v3261_v55, %v4116_v7  ;;  %v2870_v19 = vadd.f32 %v3261_v55, %v4123_v9  ;;  %v2871_v5 = vadd.f32 %v4120_v8, %v3261_v55 }
 0x52e   : > { %3445 = vmatprep.subr.mxu1 %v3764_v23  ;;  %3450 = vmatprep.subr.mxu0 %v3764_v23  ;;  %v3263_v14 = vmul.f32 -1.442695, %v2865_v46  ;;  %v3264_v0 = vmul.f32 -1.442695, %v2866_v63 }
 0x52f   : > { %3438 = vmatmul.mubr.msk.f32.vlgmr.msra.gmra.mxu1 %vm767_vm1, %v2184_v16  ;;  %3443 = vmatmul.mubr.msk.f32.vlgmr.msra.gmra.mxu0 %vm767_vm1, %v2185_v17  ;;  %v3265_v16 = vmul.f32 -1.442695, %v2867_v15  ;;  %v2869_v17 = vadd.f32 %v4113_v6, %v3261_v55  ;;  %v3266_v49 = vmul.f32 -1.442695, %v2868_v57  ;;  %v3269_v56 = vmul.f32 -1.442695, %v2871_v5 }
 0x530   : > { %3446 = vmatpush3.msra.mxu1 %v1389_v50  ;;  %3451 = vmatpush3.msra.mxu0 %v1390_v51  ;;  %3605 = vpow2.f32 %v3263_v14  ;;  %v3268_v50 = vmul.f32 -1.442695, %v2870_v19 }
 0x531   : > { %3447 = vmatprep.mubr.msk.f32.mxu1 %vm3765_vm2, %v3764_v23  ;;  %3452 = vmatprep.mubr.msk.f32.mxu0 %vm3765_vm2, %v3764_v23 }
 0x532   : > { %3455 = vmatprep.subr.mxu1 %v2931_v18 }
 0x533   : > { %3448 = vmatmul.mubr.msk.f32.vlgmr.msra.gmra.mxu1 %vm767_vm1, %v2186_v61  ;;  %3453 = vmatmul.mubr.msk.f32.vlgmr.msra.gmra.mxu0 %vm767_vm1, %v2187_v3 }
 0x534   : > { %3456 = vmatpush3.msra.mxu1 %v2931_v18 }
 0x535   : > { %3457 = vmatprep.subr.mxu1 %v2930_v10 }
 0x536   : > { %3458 = vmatpush3.msra.mxu1 %v2930_v10 }
 0x537   : > { %3459 = vmatprep.subr.mxu1 %v2929_v29 }
 0x538   : > { %3460 = vmatpush3.msra.mxu1 %v2929_v29 }
 0x539   : > { %3461 = vmatprep.subr.mxu1 %v2928_v34 }
 0x53a   : > { %3462 = vmatpush3.msra.mxu1 %v2928_v34 }
 0x53d   : > { %v3606_v51 = vpop.eup %3605 }
 0x53e   : > { %v2897_v3 = vadd.f32 1.0, %v3606_v51 }
 0x5e6   : > { %v2257_v40 = vpop.f32.mrf.mxu1  ;;  %v2330_v58 = vpop.f32.mrf.mxu0 }
 0x5e8   : > { %v3419_v20 = vpop.f32.mrf.mxu1  ;;  %v3424_v21 = vpop.f32.mrf.mxu0 }
 0x5eb   : > { %v2403_v22 = vpop.f32.mrf.mxu1  ;;  %v2476_v25 = vpop.f32.mrf.mxu0 }
 0x5ec   : > { %v2772_v59 = vcombine.low %v2257_v40, %v2403_v22  ;;  %v2780_v30 = vcombine.low %v2330_v58, %v2476_v25 }
 0x5ed   : > { %v3429_v27 = vpop.f32.mrf.mxu1  ;;  %v3434_v28 = vpop.f32.mrf.mxu0 }
 0x5ee   : > { %v2779_v2 = vrot.slane %v2772_v59, %v4142_v26  ;;  %v2787_v36 = vrot.slane %v2780_v30, %v4142_v26 }
 0x5ef   : > { %v2549_v31 = vpop.f32.mrf.mxu1  ;;  %v2622_v23 = vpop.f32.mrf.mxu0 }
 0x5f0   : > { %v2804_v52 = vcombine.low %v2779_v2, %v2787_v36  ;;  %v2805_v39 = vcombine.high %v2779_v2, %v2787_v36 }
 0x5f1   : > { %v3439_v32 = vpop.f32.mrf.mxu1  ;;  %v3444_v11 = vpop.f32.mrf.mxu0 }
 0x5f2   : > { %v2819_v41 = vrot.slane %v2805_v39, %v4147_v35  ;;  %v4357_v12 = vrot.slane %v2804_v52, %v4147_v35 }
 0x5f3   : > { %v2695_v37 = vpop.f32.mrf.mxu1  ;;  %v2768_v38 = vpop.f32.mrf.mxu0 }
 0x5f4   : > { %v2788_v42 = vcombine.low %v2549_v31, %v2695_v37  ;;  %v2796_v33 = vcombine.low %v2622_v23, %v2768_v38 }
 0x5f5   : > { %v3449_v43 = vpop.f32.mrf.mxu1  ;;  %v3454_v47 = vpop.f32.mrf.mxu0 }
 0x5f6   : > { %v2795_v62 = vrot.slane %v2788_v42, %v4142_v26  ;;  %v2803_v1 = vrot.slane %v2796_v33, %v4142_v26 }
 0x5f8   : > { %v2820_v4 = vcombine.low %v2795_v62, %v2803_v1  ;;  %v2821_v24 = vcombine.high %v2795_v62, %v2803_v1 }
 0x5fa   : > { %v2835_v53 = vrot.slane %v2821_v24, %v4147_v35  ;;  %v2828_v48 = vrot.slane %v2820_v4, %v4147_v35  ;;  %v2864_v35 = vadd.f32 %v3261_v55, %v4105_v54  ;;  %v3267_v54 = vmul.f32 -1.442695, %v2869_v17  ;;  %v3270_v24 = vld [vmem:[%s4456_s9] ss:$0 sm:$0xff] }
 0x5fc   : > { %v2838_v13 = vcombine.low %v2819_v41, %v2835_v53  ;;  %v2837_v44 = vcombine.high %v4357_v12, %v2828_v48  ;;  %v2836_v26 = vcombine.low %v4357_v12, %v2828_v48  ;;  %v2839_v45 = vcombine.high %v2819_v41, %v2835_v53 }
 0x5fd   : > { %v3262_v60 = vmul.f32 -1.442695, %v2864_v35 }
 0x5fe   : > { %2845 = vrot.lane.b32.xlu0 %v2838_v13, %s3774_s26  ;;  %2841 = vrot.lane.b32.xlu1 %v2837_v44, %s3775_s22  ;;  %s4399_s26 = scalar_lea.hbm %s4457_s10, %s3280_s27 }
 0x5ff   : > { %3607 = vpow2.f32 %v3262_v60 }
 0x600   : > { %3609 = vpow2.f32 %v3264_v0 }
 0x601   : > { %3611 = vpow2.f32 %v3265_v16 }
 0x602   : > { %2849 = vrot.lane.b32.xlu1 %v2839_v45, %s3776_s6  ;;  %3613 = vpow2.f32 %v3266_v49  ;;  %s3689_s6 = scalar_lea.vmem %s4393_s21, 1024 }
 0x603   : > { %3615 = vpow2.f32 %v3267_v54  ;;  %p3690_p0 = scmp.ne.s32.totalorder %s4393_s21, %s3689_s6  ;;  %p3697_p3 = scmp.lt.s32.totalorder %s3695_s20, %s3689_s6 }
 0x604   : > { %3617 = vpow2.f32 %v3268_v50 }
 0x605   : > { %3619 = vpow2.f32 %v3269_v56  ;;  %p3691_p9 = pnand %p3690_p0, %p4472_p1  ;;  %p3698_p7 = por %p3697_p3, %p3696_p2 }
 0x606   : > { %3621 = vrcp.f32 %v2897_v3 }
 0x607   : > { %p3692_p13 = pneg %p3691_p9 }
 0x609   : > { %p3699_p4 = pnand %p3698_p7, %p3692_p13 }
 0x60c   : > { %v3608_v7 = vpop.eup %3607 }
 0x60d   : > { %v3610_v61 = vpop.eup %3609  ;;  %v2896_v40 = vadd.f32 1.0, %v3608_v7 }
 0x60e   : > { %v3612_v6 = vpop.eup %3611  ;;  %v2898_v58 = vadd.f32 1.0, %v3610_v61 }
 0x60f   : > { %v3614_v20 = vpop.eup %3613  ;;  %3623 = vrcp.f32 %v2896_v40  ;;  %v2899_v9 = vadd.f32 1.0, %v3612_v6 }
 0x610   : > { %v3616_v21 = vpop.eup %3615  ;;  %3625 = vrcp.f32 %v2898_v58  ;;  %v2900_v8 = vadd.f32 1.0, %v3614_v20 }
 0x611   : > { %v3618_v22 = vpop.eup %3617  ;;  %3627 = vrcp.f32 %v2899_v9  ;;  %v2901_v25 = vadd.f32 1.0, %v3616_v21 }
 0x612   : > { %v3620_v27 = vpop.eup %3619  ;;  %3629 = vrcp.f32 %v2900_v8  ;;  %v2902_v28 = vadd.f32 1.0, %v3618_v22 }
 0x613   : > { %3631 = vrcp.f32 %v2901_v25  ;;  %v2903_v30 = vadd.f32 1.0, %v3620_v27  ;;  %v3622_v32 = vpop.eup %3621 }
 0x614   : > { %3633 = vrcp.f32 %v2902_v28 }
 0x615   : > { %3635 = vrcp.f32 %v2903_v30 }
 0x61c   : > { %v3624_v10 = vpop.eup %3623 }
 0x61d   : > { %v3626_v38 = vpop.eup %3625 }
 0x61e   : > { %v3628_v33 = vpop.eup %3627 }
 0x61f   : > { %v3630_v43 = vpop.eup %3629 }
 0x620   : > { %v3632_v34 = vpop.eup %3631 }
 0x621   : > { %v3634_v52 = vpop.eup %3633 }
 0x622   : > { %v3636_v1 = vpop.eup %3635 }
 0x670   : > { %v2842_v59 = vpop.permute.xlu1 %2841  ;;  %v2846_v31 = vpop.permute.xlu0 %2845 }
 0x671   : > { %v2852_v23 = vsel %vm767_vm1, %v2836_v26, %v2842_v59 }
 0x672   : > { %v2854_v18 = vsel %vm2853_vm4, %v2852_v23, %v2846_v31 }
 0x674   : > { %v2850_v11 = vpop.permute.xlu1 %2849 }
 0x675   : > { %v2856_v2 = vsel %vm2855_vm5, %v2854_v18, %v2850_v11 }
 0x676   : > { %v2920_v36 = vmul.f32 %v3624_v10, %v2856_v2  ;;  %v2921_v37 = vmul.f32 %v3622_v32, %v2856_v2  ;;  %v2922_v42 = vmul.f32 %v3626_v38, %v2856_v2  ;;  %v2923_v47 = vmul.f32 %v3628_v33, %v2856_v2 }
 0x677   : > { %v2924_v29 = vmul.f32 %v3630_v43, %v2856_v2  ;;  %v2925_v39 = vmul.f32 %v3632_v34, %v2856_v2  ;;  %v2926_v62 = vmul.f32 %v3634_v52, %v2856_v2  ;;  %v2927_v4 = vmul.f32 %v3636_v1, %v2856_v2 }
 0x678   : > { %3463 = vmatprep.mubr.msk.f32.mxu1 %vm559_vm0, %v2920_v36 }
 0x679   : > { %3464 = vmatmul.mubr.msk.f32.vlgmr.msra.gmra.mxu1 %vm559_vm0, %v2921_v37 }
 0x67a   : > { %3466 = vmatprep.mubr.msk.f32.mxu1 %vm559_vm0, %v2922_v42 }
 0x67d   : > { %3467 = vmatmul.mubr.msk.f32.gmra.mxu1 %vm559_vm0, %v2923_v47 }
 0x67e   : > { %3469 = vmatprep.mubr.msk.f32.mxu1 %vm559_vm0, %v2924_v29 }
 0x681   : > { %3470 = vmatmul.mubr.msk.f32.gmra.mxu1 %vm559_vm0, %v2925_v39 }
 0x682   : > { %3472 = vmatprep.mubr.msk.f32.mxu1 %vm559_vm0, %v2926_v62 }
 0x685   : > { %3473 = vmatmul.mubr.msk.f32.gmra.mxu1 %vm559_vm0, %v2927_v4 }
 0x739   : > { %v3465_v41 = vpop.f32.mrf.mxu1 }
 0x73a   : > { %v3035_v53 = vadd.f32 %v3465_v41, %v3270_v24 }
 0x73b   : > { %v3029_v12 = vpop.f32.mrf.mxu1 }
 0x73c   : > { %3069 = vst.msk [vmem:[%s546_s28 + $0x8] sm:$0xff] %vm559_vm0, %v3035_v53  ;;  %v3030_v48 = vadd.f32 %v3270_v24, %v3029_v12 }
 0x73d   : > { %v3468_v13 = vpop.f32.mrf.mxu1 }
 0x73e   : > { %3068 = vst.msk [vmem:[%s546_s28] sm:$0xff] %vm559_vm0, %v3030_v48  ;;  %v3045_v44 = vadd.f32 %v3468_v13, %v3270_v24 }
 0x73f   : > { %v3039_v26 = vpop.f32.mrf.mxu1 }
 0x740   : > { %3071 = vst.msk [vmem:[%s546_s28 + $0x18] sm:$0xff] %vm559_vm0, %v3045_v44  ;;  %v3040_v45 = vadd.f32 %v3270_v24, %v3039_v26 }
 0x741   : > { %v3471_v55 = vpop.f32.mrf.mxu1 }
 0x742   : > { %3070 = vst.msk [vmem:[%s546_s28 + $0x10] sm:$0xff] %vm559_vm0, %v3040_v45  ;;  %v3055_v46 = vadd.f32 %v3471_v55, %v3270_v24 }
 0x743   : > { %v3049_v35 = vpop.f32.mrf.mxu1 }
 0x744   : > { %3073 = vst.msk [vmem:[%s546_s28 + $0x28] sm:$0xff] %vm559_vm0, %v3055_v46  ;;  %v3050_v63 = vadd.f32 %v3270_v24, %v3049_v35 }
 0x745   : > { %v3474_v14 = vpop.f32.mrf.mxu1 }
 0x746   : > { %3072 = vst.msk [vmem:[%s546_s28 + $0x20] sm:$0xff] %vm559_vm0, %v3050_v63  ;;  %v3065_v60 = vadd.f32 %v3474_v14, %v3270_v24 }
 0x747   : > { %v3059_v15 = vpop.f32.mrf.mxu1 }
 0x748   : > { %3075 = vst.msk [vmem:[%s546_s28 + $0x38] sm:$0xff] %vm559_vm0, %v3065_v60  ;;  %v3060_v0 = vadd.f32 %v3270_v24, %v3059_v15 }
 0x74a   : > { %3074 = vst.msk [vmem:[%s546_s28 + $0x30] sm:$0xff] %vm559_vm0, %v3060_v0 }
 0x74b   : > { %3702 = shalt.err (!%p3699_p4)
}
 0x74c   : > { %s3703_s23 = scalar_lea.hbm %s4399_s26, 1024  ;;  %s3707_s27 = scalar_lea.hbm %s4457_s10, 2048 }
 0x74d   : > { %p3704_p5 = scmp.ne.s32.totalorder %s4399_s26, %s3703_s23  ;;  %p3708_p11 = scmp.lt.s32.totalorder %s4399_s26, %s4457_s10 }
 0x74e   : > { %p3709_p12 = scmp.lt.s32.totalorder %s3707_s27, %s3703_s23 }
 0x74f   : > { %p3705_p6 = pnand %p3704_p5, %p4472_p1 }
 0x750   : > { %p3710_p0 = por %p3709_p12, %p3708_p11 }
 0x751   : > { %p3706_p10 = pneg %p3705_p6 }
 0x753   : > { %p3711_p9 = pnand %p3710_p0, %p3706_p10 }
 0x755   : > { %3714 = shalt.err (!%p3711_p9)
}
 0x756   : > { %s3778_s6 = smov 128   ;;  %s3779_s11 = smov 256  }
 0x757   : > { %3483 = dma.vmem_to_hbm [thread:$0]  (%p4472_p1), %s4393_s21, 1024, %s4399_s26, %s4405_s17, %s3778_s6, %s3779_s11, %s3775_s22  }
 0x758 PF: > { %s3104_s18 = sand.u32 1, %s3745_s13   ;;  %p4473_p13 = scmp.ne.s32.totalorder %s4464_s25, 0 }
 0x759   : > { %s3105_s20 = scalar_lea.sflag [#allocation6], %s3104_s18 }
 0x75a   : > { %p3493_p2 = pnand %p3213_p8, %p4473_p13 }
 0x75c   : > { %p3494_p3 = pneg %p3493_p2 }
 0x75e   : > { %3740 = dma.done.wait (%p3494_p3), %s3105_s20, 1024  }
 0x75f   : > { %3742 = vsyncadd (%p3494_p3), %s3105_s20, 4294966272  ;;  %s4474_s23 = sld [smem:[#allocation13_spill]]  ;;  %p22_p7 = scmp.ge.s32.totalorder %s3860_s19, 4  }
 0x760   : > { %s4475_s13 = smov %s3749_s14  ;;  %s4476_s14 = smov %s3753_s15 }
 0x761   : > { %s4478_s16 = smov %s3860_s19  ;;  %24 = sbr.rel (!%p22_p7) target bundleno = 7 (0x7), region = 196 }
 0x765   : > { %s4477_s15 = smov %s4474_s23 }
 0x766   :  { %3110 = vsyncpa [#allocation5], 1 }
 0x767   :  { %3112 = vsyncpa [#allocation5 + $0x1], 1 }
 0x768   :  { %3113 = vsyncpa [#allocation8], 1 }
 0x769   :  { %3114 = vsyncpa [#allocation6], 1 }
 0x76a   :  { %3116 = vsyncpa [#allocation6 + $0x1], 1 }

</bundles_post_ra>
